<compile_context>
chip_gen: v6e
topology: v6e:2x2x1
jax: 0.10.0
libtpu: 0.0.40
codegen_flags: <defaults>
</compile_context>

<pallas_src>
import numpy as np
import jax
import jax.numpy as jnp
from jax import lax
from jax.experimental import pallas as pl
from jax.experimental.pallas import tpu as pltpu


# ----------------------------------------------------------------------------
# Host-side constant folding: conv weights / DFT bases -> dense matmul operands
# ----------------------------------------------------------------------------
def _blockdiag_1x1(w2d, b, wn):
  # w2d: (Cout, Cin).  (wn*Cin, wn*Cout) block-diagonal matrix + tiled bias.
  cout, cin = w2d.shape
  eye = jnp.eye(wn, dtype=jnp.float32)
  m = jnp.einsum('wv,io->wivo', eye, jnp.transpose(w2d))
  m = m.reshape(wn * cin, wn * cout).astype(jnp.float32)
  bt = jnp.tile(b, wn).reshape(1, wn * cout).astype(jnp.float32)
  return m, bt


def _banded_conv(wc, b, w_in):
  # wc: (Cout, Cin, KH, KW) torch layout.  (KH, w_in*Cin, Wo*Cout) banded
  # matrices realizing a VALID conv along the width axis, + tiled bias.
  cout, cin, kh, kw = wc.shape
  wo = w_in - kw + 1
  sel = np.zeros((kw, w_in, wo), np.float32)
  for q in range(kw):
    for v in range(wo):
      sel[q, v + q, v] = 1.0
  m = jnp.einsum('qwv,oihq->hwivo', jnp.asarray(sel), wc)
  m = m.reshape(kh, w_in * cin, wo * cout).astype(jnp.float32)
  bt = jnp.tile(b, wo).reshape(1, wo * cout).astype(jnp.float32)
  return m, bt


def _pool_constants(n_in, c):
  # AdaptiveAvgPool2d((3,3)) row/col pooling matrices + 3x3 spatial-mean matrix.
  n_out = 3
  starts = [(i * n_in) // n_out for i in range(n_out)]
  ends = [int(np.ceil((i + 1) * n_in / n_out)) for i in range(n_out)]
  a = np.zeros((n_out, n_in), np.float32)
  colsel = np.zeros((n_in, n_out), np.float32)
  for i, (s, e) in enumerate(zip(starts, ends)):
    a[i, s:e] = 1.0 / (e - s)
    colsel[s:e, i] = 1.0 / (e - s)
  eye = np.eye(c, dtype=np.float32)
  q = np.einsum('wj,ab->wajb', colsel, eye).reshape(n_in * c, n_out * c)
  tmean = np.einsum('jk,ab->jakb', np.full((3, 3), 1.0 / 9.0, np.float32),
                    eye).reshape(3 * c, 3 * c)
  return a, q, tmean


def _col_expand(m, c):
  # m: (V, J) -> E: (J*c, V*c) with E[j*c+a, v*c+b] = m[v, j] * (a == b)
  return np.einsum('vj,ab->javb', m, np.eye(c)).reshape(
      m.shape[1] * c, m.shape[0] * c)


def _r8(n):
  return ((n + 7) // 8) * 8


def _dft_constants(h, w, ks, c):
  assert h == w, "square spatial size assumed"
  npad = h + 2 * ks
  nh = npad // 2 + 1                       # Hermitian row-frequency count
  nhp = _r8(nh)                            # padded to a sublane multiple
  idx = np.arange(npad)

  F = np.exp(-2j * np.pi * np.outer(idx, idx) / npad)           # fwd DFT
  G = np.exp(2j * np.pi * np.outer(idx, idx) / npad) / npad     # inv DFT
  prep = np.zeros((npad, h))
  prep[idx, np.clip(idx - ks, 0, h - 1)] = 1.0                  # replicate pad
  A = F @ prep                                                  # (Np, H)

  c5 = ks // 2 + 1
  B5 = np.exp(-2j * np.pi * np.outer(idx, np.arange(ks) - (c5 - 1)) / npad)
  c3 = 3 // 2 + 1
  B3 = np.exp(-2j * np.pi * np.outer(idx, np.arange(3) - (c3 - 1)) / npad)

  def stack_rows(m):                       # keep rows 0..nh-1, stack [re; im]
    out = np.zeros((2 * nhp, m.shape[1]), np.float32)
    out[0:nh] = np.real(m[0:nh])
    out[nhp:nhp + nh] = np.imag(m[0:nh])
    return out

  # inverse row transform: crop + Hermitian reconstruction weights folded in
  wts = np.where((np.arange(nh) == 0) | (2 * np.arange(nh) == npad), 1.0, 2.0)
  gr = G[ks:ks + h, 0:nh] * wts[None, :]
  shf = np.zeros((h, 2 * nhp), np.float32)
  shf[:, 0:nh] = np.real(gr)
  shf[:, nhp:nhp + nh] = -np.imag(gr)

  awe = _col_expand(A, c)                  # (W*C, Np*C) complex
  swe = _col_expand(G[ks:ks + h, :], c)    # (Np*C, W*C) complex
  bw3 = _col_expand(B3, c)                 # (3*C, Np*C) complex
  bw5 = np.repeat(B5.T, c, axis=1)         # (ks, Np*C) complex, channel-bcast

  def pad8(m):
    out = np.zeros((_r8(m.shape[0]), m.shape[1]), np.float32)
    out[:m.shape[0]] = m
    return out

  cw208 = np.concatenate([np.real(bw3), np.imag(bw3),
                          pad8(np.real(bw5)), pad8(np.imag(bw5))], axis=0)
  awe_both = np.concatenate([np.real(awe), np.imag(awe)], axis=0)
  swe_both = np.concatenate([np.real(swe), np.imag(swe)], axis=0)

  return dict(nh=nh, nhp=nhp, npad=npad,
              ahs=stack_rows(A), bh3s=stack_rows(B3), bh5s=stack_rows(B5),
              shf=shf, cw208=cw208, awe_both=awe_both, swe_both=swe_both)


def _pack_slab(blocks, width):
  """blocks: list of (array, aligned_rows). -> (f32 slab, row offsets)."""
  parts, offs, row = [], [], 0
  for arr, rows in blocks:
    arr = jnp.asarray(arr, jnp.float32)
    pad = jnp.zeros((rows, width), jnp.float32)
    pad = pad.at[:arr.shape[0], :arr.shape[1]].set(arr)
    parts.append(pad)
    offs.append(row)
    row += rows
  return jnp.concatenate(parts, axis=0), offs


# ----------------------------------------------------------------------------
# CLS.forward -- one fused pallas_call, one grid step per batch sample.
# ----------------------------------------------------------------------------
def cls_forward(x, kernel, params):
  """x: (B, nf, H, W) f32; kernel: (B, 1, ks, ks); returns (B, nf, H, W)."""
  b, nf, h, w = x.shape
  assert h == w
  ks = kernel.shape[-1]
  c = params['w_red'].shape[0]
  wc, wnf = w * c, w * nf
  assert (3 * c) % 8 == 0 and wc % 8 == 0

  f32, bf16 = jnp.float32, jnp.bfloat16

  # ---- static (numpy) constants --------------------------------------------
  dft = _dft_constants(h, w, ks, c)
  nh, nhp, npad = dft['nh'], dft['nhp'], dft['npad']
  npc = npad * c
  a_pool, q_pool, tmean = _pool_constants(w - 6, c)

  # ---- param-dependent (jnp, traceable) constants ---------------------------
  m_red, b_red = _blockdiag_1x1(params['w_red'].reshape(c, nf), params['b_red'], w)
  m1, b1 = _banded_conv(params['w_g1'], params['b_g1'], w)
  m2, b2 = _banded_conv(params['w_g2'], params['b_g2'], w - 2)
  m3, b3 = _banded_conv(params['w_g3'], params['b_g3'], w - 4)
  m4, b4 = _blockdiag_1x1(params['w_g4'].reshape(c, c), params['b_g4'], 3)
  m_exp, b_exp = _blockdiag_1x1(params['w_exp'].reshape(nf, c), params['b_exp'], w)

  # ---- one lane-dense bf16 slab for all the small constants -----------------
  slab_w = max(128, wc)
  blocks = [(b_red, 8), (b1, 8), (b2, 8), (b3, 8), (b4, 8),
            (a_pool, 8), (m4, _r8(3 * c)), (tmean, _r8(3 * c)),
            (q_pool, _r8((w - 6) * c)),
            (dft['ahs'], 2 * nhp), (dft['bh3s'], 2 * nhp), (dft['bh5s'], 2 * nhp),
            (dft['shf'], _r8(h))]
  slab, offs = _pack_slab(blocks, slab_w)
  (O_BRED, O_B1, O_B2, O_B3, O_B4, O_APOOL, O_M4, O_TMEAN, O_QPOOL,
   O_AHS, O_BH3S, O_BH5S, O_SHF) = offs
  cs = slab.astype(bf16)

  # large constants: bf16 storage, packed re/im into single slabs
  m_red_b, m_exp_b = m_red.astype(bf16), m_exp.astype(bf16)
  m1_b, m2_b, m3_b = m1.astype(bf16), m2.astype(bf16), m3.astype(bf16)
  cw208 = jnp.asarray(dft['cw208'], bf16)      # (6c + 2*r8(ks), Np*C)
  awe = jnp.asarray(dft['awe_both'], bf16)     # (2*W*C, Np*C)
  swe = jnp.asarray(dft['swe_both'], bf16)     # (2*Np*C, W*C)
  o_bw3r, o_bw3i, o_bw5r, o_bw5i = 0, 3 * c, 6 * c, 6 * c + _r8(ks)

  x_l = jnp.transpose(x, (0, 2, 3, 1)).reshape(b, h, wnf).astype(f32)
  kb = kernel.reshape(b, ks, ks).astype(f32)

  def dotb(a, m):
    return jnp.dot(a.astype(bf16), m.astype(bf16), preferred_element_type=f32)

  # --------------------------------------------------------------------------
  def kernel_fn(x_ref, k_ref, cs_ref, m_red_ref, m1_ref, m2_ref, m3_ref,
                m_exp_ref, b_exp_ref, cw_ref, awe_ref, swe_ref, o_ref):

    def swapneg(s):
      # [a; b] -> [-b; a]; halves are sublane-aligned (nhp rows each).
      r = s.shape[0] // 2
      return jnp.concatenate([-s[r:], s[:r]], axis=0)

    xs = x_ref[0]                                                # (H, W*nf)

    # ---- reduce_feature: 1x1 conv (nf -> C) as block-diagonal matmul -------
    cls_f = dotb(xs, m_red_ref[...]) + cs_ref[O_BRED:O_BRED + 1, 0:wc].astype(f32)

    # ---- grad_filter: three VALID 3x3 convs (banded matmuls per kh) --------
    def conv3(inp, m_ref, boff, bw, ho, leaky):
      acc = (dotb(inp[0:ho, :], m_ref[0]) +
             dotb(inp[1:ho + 1, :], m_ref[1]) +
             dotb(inp[2:ho + 2, :], m_ref[2]) +
             cs_ref[boff:boff + 1, 0:bw].astype(f32))
      if leaky:
        acc = jnp.where(acc >= 0, acc, 0.1 * acc)                # LeakyReLU(0.1)
      return acc

    g1 = conv3(cls_f, m1_ref, O_B1, (w - 2) * c, h - 2, True)    # (H-2,(W-2)C)
    g2 = conv3(g1, m2_ref, O_B2, (w - 4) * c, h - 4, True)       # (H-4,(W-4)C)
    g3 = conv3(g2, m3_ref, O_B3, (w - 6) * c, h - 6, False)      # (H-6,(W-6)C)

    # ---- AdaptiveAvgPool2d((3,3)) + final 1x1 conv of grad_filter ----------
    a_p = cs_ref[O_APOOL:O_APOOL + 3, 0:h - 6]                   # (3, H-6)
    q_p = cs_ref[O_QPOOL:O_QPOOL + (w - 6) * c, 0:3 * c]         # ((W-6)C, 3C)
    m4_w = cs_ref[O_M4:O_M4 + 3 * c, 0:3 * c]
    pooled = dotb(dotb(a_p, g3), q_p)                            # (3, 3C)
    g4 = dotb(pooled, m4_w) + cs_ref[O_B4:O_B4 + 1, 0:3 * c].astype(f32)

    # ---- kernel_P = exp(.) - spatial mean ----------------------------------
    kp = jnp.exp(g4)
    colsum = jnp.sum(kp, axis=0, keepdims=True)
    kp = kp - dotb(colsum, cs_ref[O_TMEAN:O_TMEAN + 3 * c, 0:3 * c])

    # ---- row (height) DFT: single dot per operand with [re; im] bases ------
    n1 = dotb(cs_ref[O_AHS:O_AHS + 2 * nhp, 0:h], cls_f)         # (2Nh, W*C)
    u = dotb(cs_ref[O_BH3S:O_BH3S + 2 * nhp, 0:3], kp)           # (2Nh, 3C)
    t = dotb(cs_ref[O_BH5S:O_BH5S + 2 * nhp, 0:ks], k_ref[0])    # (2Nh, ks)

    # ---- column (width) DFT: complex x complex as two real dots each -------
    pf = (dotb(u, cw_ref[o_bw3r:o_bw3r + 3 * c, :]) +
          dotb(swapneg(u), cw_ref[o_bw3i:o_bw3i + 3 * c, :]))    # (2Nh, Np*C)
    kf = (dotb(t, cw_ref[o_bw5r:o_bw5r + ks, :]) +
          dotb(swapneg(t), cw_ref[o_bw5i:o_bw5i + ks, :]))       # (2Nh, Np*C)
    num = (dotb(n1, awe_ref[0:wc, :]) +
           dotb(swapneg(n1), awe_ref[wc:2 * wc, :]))             # (2Nh, Np*C)

    # ---- Wiener solve: y = conj(Kf) * num / (|Kf|^2 + |Pf|^2), f32 ---------
    sq = kf * kf + pf * pf
    denom = sq[0:nhp] + sq[nhp:2 * nhp]                          # (Nh, Np*C)
    row = lax.broadcasted_iota(jnp.int32, (nhp, 1), 0)
    denom = jnp.where(row >= nh, 1.0, denom)     # zero-padded Hermitian rows
    inv = pl.reciprocal(denom, approx=False)     # computed once, exact

    kf_re, kf_im = kf[0:nhp], kf[nhp:2 * nhp]
    nm_re, nm_im = num[0:nhp], num[nhp:2 * nhp]
    y_re = (kf_re * nm_re + kf_im * nm_im) * inv
    y_im = (kf_re * nm_im - kf_im * nm_re) * inv
    y = jnp.concatenate([y_re, y_im], axis=0)                    # (2Nh, Np*C)

    # ---- inverse width DFT (+ crop), then real(inverse height DFT) ---------
    wst = (dotb(y, swe_ref[0:npc, :]) +
           dotb(swapneg(y), swe_ref[npc:2 * npc, :]))            # (2Nh, W*C)
    clear = dotb(cs_ref[O_SHF:O_SHF + h, 0:2 * nhp], wst)        # (H, W*C)

    # ---- expand_feature: 1x1 conv (C -> nf), lane-dense output -------------
    o_ref[0] = dotb(clear, m_exp_ref[...]) + b_exp_ref[...]

  # --------------------------------------------------------------------------
  consts = [cs, m_red_b, m1_b, m2_b, m3_b, m_exp_b, b_exp, cw208, awe, swe]

  def bcast(nd):
    return lambda i: (0,) * nd

  in_specs = [pl.BlockSpec((1, h, wnf), lambda i: (i, 0, 0)),
              pl.BlockSpec((1, ks, ks), lambda i: (i, 0, 0))]
  in_specs += [pl.BlockSpec(a.shape, bcast(a.ndim)) for a in consts]

  out_l = pl.pallas_call(
      kernel_fn,
      out_shape=jax.ShapeDtypeStruct((b, h, wnf), jnp.float32),
      grid=(b,),
      in_specs=in_specs,
      out_specs=pl.BlockSpec((1, h, wnf), lambda i: (i, 0, 0)),
      compiler_params=pltpu.CompilerParams(
          dimension_semantics=("parallel",)),
  )(x_l, kb, *consts)

  return jnp.transpose(out_l.reshape(b, h, w, nf), (0, 3, 1, 2))


# ----------------------------------------------------------------------------
# Deterministic PyTorch-like parameters
# ----------------------------------------------------------------------------
def init_cls_params(key, nf=32, reduction=4):
  c = nf // reduction
  keys = jax.random.split(key, 12)

  def conv_w(k, cout, cin, kh, kw):
    bound = 1.0 / np.sqrt(cin * kh * kw)
    return jax.random.uniform(k, (cout, cin, kh, kw), jnp.float32, -bound, bound)

  def conv_b(k, cout, fan_in):
    bound = 1.0 / np.sqrt(fan_in)
    return jax.random.uniform(k, (cout,), jnp.float32, -bound, bound)

  return dict(
      w_red=conv_w(keys[0], c, nf, 1, 1), b_red=conv_b(keys[1], c, nf),
      w_g1=conv_w(keys[2], c, c, 3, 3), b_g1=conv_b(keys[3], c, c * 9),
      w_g2=conv_w(keys[4], c, c, 3, 3), b_g2=conv_b(keys[5], c, c * 9),
      w_g3=conv_w(keys[6], c, c, 3, 3), b_g3=conv_b(keys[7], c, c * 9),
      w_g4=conv_w(keys[8], c, c, 1, 1), b_g4=conv_b(keys[9], c, c),
      w_exp=conv_w(keys[10], nf, c, 1, 1), b_exp=conv_b(keys[11], nf, c),
  )


# ----------------------------------------------------------------------------
if __name__ == "__main__":
  nf, reduction = 32, 4
  batch, height, width, ks = 2, 16, 16, 5

  key = jax.random.PRNGKey(0)
  pkey, xkey, kkey = jax.random.split(key, 3)
  params = init_cls_params(pkey, nf, reduction)

  x = jax.random.normal(xkey, (batch, nf, height, width), jnp.float32)
  kraw = jax.random.uniform(kkey, (batch, 1, ks, ks), jnp.float32, 0.05, 1.0)
  kernel = kraw / jnp.sum(kraw, axis=(2, 3), keepdims=True)   # PSF-like blur

  out = jax.jit(cls_forward)(x, kernel, params)
  out = jax.block_until_ready(out)

  assert out.shape == (batch, nf, height, width), out.shape
  assert bool(jnp.all(jnp.isfinite(out)))
  print("KERNEL_OK")
</pallas_src>

<mosaic_0001>
module attributes {stable_mosaic.version = 11 : i64} {
  func.func @kernel_fn(%arg0: i32, %arg1: memref<1x16x512xf32, #tpu.memory_space<vmem>>, %arg2: memref<1x5x5xf32, #tpu.memory_space<vmem>>, %arg3: memref<288x128xbf16, #tpu.memory_space<vmem>>, %arg4: memref<512x128xbf16, #tpu.memory_space<vmem>>, %arg5: memref<3x128x112xbf16, #tpu.memory_space<vmem>>, %arg6: memref<3x112x96xbf16, #tpu.memory_space<vmem>>, %arg7: memref<3x96x80xbf16, #tpu.memory_space<vmem>>, %arg8: memref<128x512xbf16, #tpu.memory_space<vmem>>, %arg9: memref<1x512xf32, #tpu.memory_space<vmem>>, %arg10: memref<64x208xbf16, #tpu.memory_space<vmem>>, %arg11: memref<256x208xbf16, #tpu.memory_space<vmem>>, %arg12: memref<416x128xbf16, #tpu.memory_space<vmem>>, %arg13: memref<1x16x512xf32, #tpu.memory_space<vmem>>) attributes {dimension_semantics = [#tpu.dimension_semantics<parallel>], iteration_bounds = array<i64: 2>, scalar_prefetch = 0 : i64, scratch_operands = 0 : i64, tpu.core_type = #tpu.core_type<tc>, window_params = [{transform_indices = @transform_0, window_bounds = array<i64: 1, 16, 512>}, {transform_indices = @transform_1, window_bounds = array<i64: 1, 5, 5>}, {pipeline_mode = #tpu.pipeline_mode<synchronous>, transform_indices = @transform_2, window_bounds = array<i64: 288, 128>}, {pipeline_mode = #tpu.pipeline_mode<synchronous>, transform_indices = @transform_3, window_bounds = array<i64: 512, 128>}, {pipeline_mode = #tpu.pipeline_mode<synchronous>, transform_indices = @transform_4, window_bounds = array<i64: 3, 128, 112>}, {pipeline_mode = #tpu.pipeline_mode<synchronous>, transform_indices = @transform_5, window_bounds = array<i64: 3, 112, 96>}, {pipeline_mode = #tpu.pipeline_mode<synchronous>, transform_indices = @transform_6, window_bounds = array<i64: 3, 96, 80>}, {pipeline_mode = #tpu.pipeline_mode<synchronous>, transform_indices = @transform_7, window_bounds = array<i64: 128, 512>}, {pipeline_mode = #tpu.pipeline_mode<synchronous>, transform_indices = @transform_8, window_bounds = array<i64: 1, 512>}, {pipeline_mode = #tpu.pipeline_mode<synchronous>, transform_indices = @transform_9, window_bounds = array<i64: 64, 208>}, {pipeline_mode = #tpu.pipeline_mode<synchronous>, transform_indices = @transform_10, window_bounds = array<i64: 256, 208>}, {pipeline_mode = #tpu.pipeline_mode<synchronous>, transform_indices = @transform_11, window_bounds = array<i64: 416, 128>}, {transform_indices = @transform_12, window_bounds = array<i64: 1, 16, 512>}]} {
    %c0 = arith.constant 0 : index
    %c0_0 = arith.constant 0 : index
    %c0_1 = arith.constant 0 : index
    %0 = vector.load %arg1[%c0, %c0_0, %c0_1] : memref<1x16x512xf32, #tpu.memory_space<vmem>>, vector<1x16x512xf32>
    %1 = vector.shape_cast %0 : vector<1x16x512xf32> to vector<16x512xf32>
    %c0_2 = arith.constant 0 : index
    %c0_3 = arith.constant 0 : index
    %2 = vector.load %arg4[%c0_2, %c0_3] : memref<512x128xbf16, #tpu.memory_space<vmem>>, vector<512x128xbf16>
    %3 = arith.truncf %1 : vector<16x512xf32> to vector<16x512xbf16>
    %cst = arith.constant dense<0.000000e+00> : vector<16x128xf32>
    %4 = tpu.matmul %3, %2, %cst {dimension_numbers = #tpu.dot_dimension_numbers<[1], [0], [0], [1], [0, 0, 1, 1], [], []>} : vector<16x512xbf16>, vector<512x128xbf16>, vector<16x128xf32> -> vector<16x128xf32>
    %c0_4 = arith.constant 0 : index
    %c0_5 = arith.constant 0 : index
    %5 = vector.load %arg3[%c0_4, %c0_5] : memref<288x128xbf16, #tpu.memory_space<vmem>>, vector<1x128xbf16>
    %6 = arith.extf %5 : vector<1x128xbf16> to vector<1x128xf32>
    %7 = vector.broadcast %6 : vector<1x128xf32> to vector<16x128xf32>
    %8 = arith.addf %4, %7 : vector<16x128xf32>
    %9 = vector.extract_strided_slice %8 {offsets = [0, 0], sizes = [14, 128], strides = [1, 1]} : vector<16x128xf32> to vector<14x128xf32>
    %c0_6 = arith.constant 0 : index
    %c0_7 = arith.constant 0 : index
    %c0_8 = arith.constant 0 : index
    %10 = vector.load %arg5[%c0_6, %c0_7, %c0_8] : memref<3x128x112xbf16, #tpu.memory_space<vmem>>, vector<1x128x112xbf16>
    %11 = vector.shape_cast %10 : vector<1x128x112xbf16> to vector<128x112xbf16>
    %12 = arith.truncf %9 : vector<14x128xf32> to vector<14x128xbf16>
    %cst_9 = arith.constant dense<0.000000e+00> : vector<14x112xf32>
    %13 = tpu.matmul %12, %11, %cst_9 {dimension_numbers = #tpu.dot_dimension_numbers<[1], [0], [0], [1], [0, 0, 1, 1], [], []>} : vector<14x128xbf16>, vector<128x112xbf16>, vector<14x112xf32> -> vector<14x112xf32>
    %14 = vector.extract_strided_slice %8 {offsets = [1, 0], sizes = [14, 128], strides = [1, 1]} : vector<16x128xf32> to vector<14x128xf32>
    %c1 = arith.constant 1 : index
    %c0_10 = arith.constant 0 : index
    %c0_11 = arith.constant 0 : index
    %15 = vector.load %arg5[%c1, %c0_10, %c0_11] : memref<3x128x112xbf16, #tpu.memory_space<vmem>>, vector<1x128x112xbf16>
    %16 = vector.shape_cast %15 : vector<1x128x112xbf16> to vector<128x112xbf16>
    %17 = arith.truncf %14 : vector<14x128xf32> to vector<14x128xbf16>
    %cst_12 = arith.constant dense<0.000000e+00> : vector<14x112xf32>
    %18 = tpu.matmul %17, %16, %cst_12 {dimension_numbers = #tpu.dot_dimension_numbers<[1], [0], [0], [1], [0, 0, 1, 1], [], []>} : vector<14x128xbf16>, vector<128x112xbf16>, vector<14x112xf32> -> vector<14x112xf32>
    %19 = arith.addf %13, %18 : vector<14x112xf32>
    %20 = vector.extract_strided_slice %8 {offsets = [2, 0], sizes = [14, 128], strides = [1, 1]} : vector<16x128xf32> to vector<14x128xf32>
    %c2 = arith.constant 2 : index
    %c0_13 = arith.constant 0 : index
    %c0_14 = arith.constant 0 : index
    %21 = vector.load %arg5[%c2, %c0_13, %c0_14] : memref<3x128x112xbf16, #tpu.memory_space<vmem>>, vector<1x128x112xbf16>
    %22 = vector.shape_cast %21 : vector<1x128x112xbf16> to vector<128x112xbf16>
    %23 = arith.truncf %20 : vector<14x128xf32> to vector<14x128xbf16>
    %cst_15 = arith.constant dense<0.000000e+00> : vector<14x112xf32>
    %24 = tpu.matmul %23, %22, %cst_15 {dimension_numbers = #tpu.dot_dimension_numbers<[1], [0], [0], [1], [0, 0, 1, 1], [], []>} : vector<14x128xbf16>, vector<128x112xbf16>, vector<14x112xf32> -> vector<14x112xf32>
    %25 = arith.addf %19, %24 : vector<14x112xf32>
    %c8 = arith.constant 8 : index
    %c0_16 = arith.constant 0 : index
    %26 = vector.load %arg3[%c8, %c0_16] : memref<288x128xbf16, #tpu.memory_space<vmem>>, vector<1x112xbf16>
    %27 = arith.extf %26 : vector<1x112xbf16> to vector<1x112xf32>
    %28 = vector.broadcast %27 : vector<1x112xf32> to vector<14x112xf32>
    %29 = arith.addf %25, %28 : vector<14x112xf32>
    %cst_17 = arith.constant 0.000000e+00 : f32
    %30 = vector.broadcast %cst_17 : f32 to vector<14x112xf32>
    %31 = arith.cmpf oge, %29, %30 : vector<14x112xf32>
    %cst_18 = arith.constant 1.000000e-01 : f32
    %32 = vector.broadcast %cst_18 : f32 to vector<14x112xf32>
    %33 = arith.mulf %32, %29 : vector<14x112xf32>
    %34 = arith.select %31, %29, %33 : vector<14x112xi1>, vector<14x112xf32>
    %35 = vector.extract_strided_slice %34 {offsets = [0, 0], sizes = [12, 112], strides = [1, 1]} : vector<14x112xf32> to vector<12x112xf32>
    %c0_19 = arith.constant 0 : index
    %c0_20 = arith.constant 0 : index
    %c0_21 = arith.constant 0 : index
    %36 = vector.load %arg6[%c0_19, %c0_20, %c0_21] : memref<3x112x96xbf16, #tpu.memory_space<vmem>>, vector<1x112x96xbf16>
    %37 = vector.shape_cast %36 : vector<1x112x96xbf16> to vector<112x96xbf16>
    %38 = arith.truncf %35 : vector<12x112xf32> to vector<12x112xbf16>
    %cst_22 = arith.constant dense<0.000000e+00> : vector<12x96xf32>
    %39 = tpu.matmul %38, %37, %cst_22 {dimension_numbers = #tpu.dot_dimension_numbers<[1], [0], [0], [1], [0, 0, 1, 1], [], []>} : vector<12x112xbf16>, vector<112x96xbf16>, vector<12x96xf32> -> vector<12x96xf32>
    %40 = vector.extract_strided_slice %34 {offsets = [1, 0], sizes = [12, 112], strides = [1, 1]} : vector<14x112xf32> to vector<12x112xf32>
    %c1_23 = arith.constant 1 : index
    %c0_24 = arith.constant 0 : index
    %c0_25 = arith.constant 0 : index
    %41 = vector.load %arg6[%c1_23, %c0_24, %c0_25] : memref<3x112x96xbf16, #tpu.memory_space<vmem>>, vector<1x112x96xbf16>
    %42 = vector.shape_cast %41 : vector<1x112x96xbf16> to vector<112x96xbf16>
    %43 = arith.truncf %40 : vector<12x112xf32> to vector<12x112xbf16>
    %cst_26 = arith.constant dense<0.000000e+00> : vector<12x96xf32>
    %44 = tpu.matmul %43, %42, %cst_26 {dimension_numbers = #tpu.dot_dimension_numbers<[1], [0], [0], [1], [0, 0, 1, 1], [], []>} : vector<12x112xbf16>, vector<112x96xbf16>, vector<12x96xf32> -> vector<12x96xf32>
    %45 = arith.addf %39, %44 : vector<12x96xf32>
    %46 = vector.extract_strided_slice %34 {offsets = [2, 0], sizes = [12, 112], strides = [1, 1]} : vector<14x112xf32> to vector<12x112xf32>
    %c2_27 = arith.constant 2 : index
    %c0_28 = arith.constant 0 : index
    %c0_29 = arith.constant 0 : index
    %47 = vector.load %arg6[%c2_27, %c0_28, %c0_29] : memref<3x112x96xbf16, #tpu.memory_space<vmem>>, vector<1x112x96xbf16>
    %48 = vector.shape_cast %47 : vector<1x112x96xbf16> to vector<112x96xbf16>
    %49 = arith.truncf %46 : vector<12x112xf32> to vector<12x112xbf16>
    %cst_30 = arith.constant dense<0.000000e+00> : vector<12x96xf32>
    %50 = tpu.matmul %49, %48, %cst_30 {dimension_numbers = #tpu.dot_dimension_numbers<[1], [0], [0], [1], [0, 0, 1, 1], [], []>} : vector<12x112xbf16>, vector<112x96xbf16>, vector<12x96xf32> -> vector<12x96xf32>
    %51 = arith.addf %45, %50 : vector<12x96xf32>
    %c16 = arith.constant 16 : index
    %c0_31 = arith.constant 0 : index
    %52 = vector.load %arg3[%c16, %c0_31] : memref<288x128xbf16, #tpu.memory_space<vmem>>, vector<1x96xbf16>
    %53 = arith.extf %52 : vector<1x96xbf16> to vector<1x96xf32>
    %54 = vector.broadcast %53 : vector<1x96xf32> to vector<12x96xf32>
    %55 = arith.addf %51, %54 : vector<12x96xf32>
    %cst_32 = arith.constant 0.000000e+00 : f32
    %56 = vector.broadcast %cst_32 : f32 to vector<12x96xf32>
    %57 = arith.cmpf oge, %55, %56 : vector<12x96xf32>
    %cst_33 = arith.constant 1.000000e-01 : f32
    %58 = vector.broadcast %cst_33 : f32 to vector<12x96xf32>
    %59 = arith.mulf %58, %55 : vector<12x96xf32>
    %60 = arith.select %57, %55, %59 : vector<12x96xi1>, vector<12x96xf32>
    %61 = vector.extract_strided_slice %60 {offsets = [0, 0], sizes = [10, 96], strides = [1, 1]} : vector<12x96xf32> to vector<10x96xf32>
    %c0_34 = arith.constant 0 : index
    %c0_35 = arith.constant 0 : index
    %c0_36 = arith.constant 0 : index
    %62 = vector.load %arg7[%c0_34, %c0_35, %c0_36] : memref<3x96x80xbf16, #tpu.memory_space<vmem>>, vector<1x96x80xbf16>
    %63 = vector.shape_cast %62 : vector<1x96x80xbf16> to vector<96x80xbf16>
    %64 = arith.truncf %61 : vector<10x96xf32> to vector<10x96xbf16>
    %cst_37 = arith.constant dense<0.000000e+00> : vector<10x80xf32>
    %65 = tpu.matmul %64, %63, %cst_37 {dimension_numbers = #tpu.dot_dimension_numbers<[1], [0], [0], [1], [0, 0, 1, 1], [], []>} : vector<10x96xbf16>, vector<96x80xbf16>, vector<10x80xf32> -> vector<10x80xf32>
    %66 = vector.extract_strided_slice %60 {offsets = [1, 0], sizes = [10, 96], strides = [1, 1]} : vector<12x96xf32> to vector<10x96xf32>
    %c1_38 = arith.constant 1 : index
    %c0_39 = arith.constant 0 : index
    %c0_40 = arith.constant 0 : index
    %67 = vector.load %arg7[%c1_38, %c0_39, %c0_40] : memref<3x96x80xbf16, #tpu.memory_space<vmem>>, vector<1x96x80xbf16>
    %68 = vector.shape_cast %67 : vector<1x96x80xbf16> to vector<96x80xbf16>
    %69 = arith.truncf %66 : vector<10x96xf32> to vector<10x96xbf16>
    %cst_41 = arith.constant dense<0.000000e+00> : vector<10x80xf32>
    %70 = tpu.matmul %69, %68, %cst_41 {dimension_numbers = #tpu.dot_dimension_numbers<[1], [0], [0], [1], [0, 0, 1, 1], [], []>} : vector<10x96xbf16>, vector<96x80xbf16>, vector<10x80xf32> -> vector<10x80xf32>
    %71 = arith.addf %65, %70 : vector<10x80xf32>
    %72 = vector.extract_strided_slice %60 {offsets = [2, 0], sizes = [10, 96], strides = [1, 1]} : vector<12x96xf32> to vector<10x96xf32>
    %c2_42 = arith.constant 2 : index
    %c0_43 = arith.constant 0 : index
    %c0_44 = arith.constant 0 : index
    %73 = vector.load %arg7[%c2_42, %c0_43, %c0_44] : memref<3x96x80xbf16, #tpu.memory_space<vmem>>, vector<1x96x80xbf16>
    %74 = vector.shape_cast %73 : vector<1x96x80xbf16> to vector<96x80xbf16>
    %75 = arith.truncf %72 : vector<10x96xf32> to vector<10x96xbf16>
    %cst_45 = arith.constant dense<0.000000e+00> : vector<10x80xf32>
    %76 = tpu.matmul %75, %74, %cst_45 {dimension_numbers = #tpu.dot_dimension_numbers<[1], [0], [0], [1], [0, 0, 1, 1], [], []>} : vector<10x96xbf16>, vector<96x80xbf16>, vector<10x80xf32> -> vector<10x80xf32>
    %77 = arith.addf %71, %76 : vector<10x80xf32>
    %c24 = arith.constant 24 : index
    %c0_46 = arith.constant 0 : index
    %78 = vector.load %arg3[%c24, %c0_46] : memref<288x128xbf16, #tpu.memory_space<vmem>>, vector<1x80xbf16>
    %79 = arith.extf %78 : vector<1x80xbf16> to vector<1x80xf32>
    %80 = vector.broadcast %79 : vector<1x80xf32> to vector<10x80xf32>
    %81 = arith.addf %77, %80 : vector<10x80xf32>
    %c40 = arith.constant 40 : index
    %c0_47 = arith.constant 0 : index
    %82 = vector.load %arg3[%c40, %c0_47] : memref<288x128xbf16, #tpu.memory_space<vmem>>, vector<3x10xbf16>
    %c96 = arith.constant 96 : index
    %c0_48 = arith.constant 0 : index
    %83 = vector.load %arg3[%c96, %c0_48] : memref<288x128xbf16, #tpu.memory_space<vmem>>, vector<80x24xbf16>
    %c48 = arith.constant 48 : index
    %c0_49 = arith.constant 0 : index
    %84 = vector.load %arg3[%c48, %c0_49] : memref<288x128xbf16, #tpu.memory_space<vmem>>, vector<24x24xbf16>
    %85 = arith.truncf %81 : vector<10x80xf32> to vector<10x80xbf16>
    %cst_50 = arith.constant dense<0.000000e+00> : vector<3x80xf32>
    %86 = tpu.matmul %82, %85, %cst_50 {dimension_numbers = #tpu.dot_dimension_numbers<[1], [0], [0], [1], [0, 0, 1, 1], [], []>} : vector<3x10xbf16>, vector<10x80xbf16>, vector<3x80xf32> -> vector<3x80xf32>
    %87 = arith.truncf %86 : vector<3x80xf32> to vector<3x80xbf16>
    %cst_51 = arith.constant dense<0.000000e+00> : vector<3x24xf32>
    %88 = tpu.matmul %87, %83, %cst_51 {dimension_numbers = #tpu.dot_dimension_numbers<[1], [0], [0], [1], [0, 0, 1, 1], [], []>} : vector<3x80xbf16>, vector<80x24xbf16>, vector<3x24xf32> -> vector<3x24xf32>
    %89 = arith.truncf %88 : vector<3x24xf32> to vector<3x24xbf16>
    %cst_52 = arith.constant dense<0.000000e+00> : vector<3x24xf32>
    %90 = tpu.matmul %89, %84, %cst_52 {dimension_numbers = #tpu.dot_dimension_numbers<[1], [0], [0], [1], [0, 0, 1, 1], [], []>} : vector<3x24xbf16>, vector<24x24xbf16>, vector<3x24xf32> -> vector<3x24xf32>
    %c32 = arith.constant 32 : index
    %c0_53 = arith.constant 0 : index
    %91 = vector.load %arg3[%c32, %c0_53] : memref<288x128xbf16, #tpu.memory_space<vmem>>, vector<1x24xbf16>
    %92 = arith.extf %91 : vector<1x24xbf16> to vector<1x24xf32>
    %93 = vector.broadcast %92 : vector<1x24xf32> to vector<3x24xf32>
    %94 = arith.addf %90, %93 : vector<3x24xf32>
    %95 = math.exp %94 : vector<3x24xf32>
    %cst_54 = arith.constant dense<0.000000e+00> : vector<24xf32>
    %96 = vector.multi_reduction <add>, %95, %cst_54 [0] : vector<3x24xf32> to vector<24xf32>
    %97 = vector.shape_cast %96 : vector<24xf32> to vector<1x24xf32>
    %c72 = arith.constant 72 : index
    %c0_55 = arith.constant 0 : index
    %98 = vector.load %arg3[%c72, %c0_55] : memref<288x128xbf16, #tpu.memory_space<vmem>>, vector<24x24xbf16>
    %99 = arith.truncf %97 : vector<1x24xf32> to vector<1x24xbf16>
    %cst_56 = arith.constant dense<0.000000e+00> : vector<1x24xf32>
    %100 = tpu.matmul %99, %98, %cst_56 {dimension_numbers = #tpu.dot_dimension_numbers<[1], [0], [0], [1], [0, 0, 1, 1], [], []>} : vector<1x24xbf16>, vector<24x24xbf16>, vector<1x24xf32> -> vector<1x24xf32>
    %101 = vector.broadcast %100 : vector<1x24xf32> to vector<3x24xf32>
    %102 = arith.subf %95, %101 : vector<3x24xf32>
    %c176 = arith.constant 176 : index
    %c0_57 = arith.constant 0 : index
    %103 = vector.load %arg3[%c176, %c0_57] : memref<288x128xbf16, #tpu.memory_space<vmem>>, vector<32x16xbf16>
    %104 = arith.truncf %8 : vector<16x128xf32> to vector<16x128xbf16>
    %cst_58 = arith.constant dense<0.000000e+00> : vector<32x128xf32>
    %105 = tpu.matmul %103, %104, %cst_58 {dimension_numbers = #tpu.dot_dimension_numbers<[1], [0], [0], [1], [0, 0, 1, 1], [], []>} : vector<32x16xbf16>, vector<16x128xbf16>, vector<32x128xf32> -> vector<32x128xf32>
    %c208 = arith.constant 208 : index
    %c0_59 = arith.constant 0 : index
    %106 = vector.load %arg3[%c208, %c0_59] : memref<288x128xbf16, #tpu.memory_space<vmem>>, vector<32x3xbf16>
    %107 = arith.truncf %102 : vector<3x24xf32> to vector<3x24xbf16>
    %cst_60 = arith.constant dense<0.000000e+00> : vector<32x24xf32>
    %108 = tpu.matmul %106, %107, %cst_60 {dimension_numbers = #tpu.dot_dimension_numbers<[1], [0], [0], [1], [0, 0, 1, 1], [], []>} : vector<32x3xbf16>, vector<3x24xbf16>, vector<32x24xf32> -> vector<32x24xf32>
    %c240 = arith.constant 240 : index
    %c0_61 = arith.constant 0 : index
    %109 = vector.load %arg3[%c240, %c0_61] : memref<288x128xbf16, #tpu.memory_space<vmem>>, vector<32x5xbf16>
    %c0_62 = arith.constant 0 : index
    %c0_63 = arith.constant 0 : index
    %c0_64 = arith.constant 0 : index
    %110 = vector.load %arg2[%c0_62, %c0_63, %c0_64] : memref<1x5x5xf32, #tpu.memory_space<vmem>>, vector<1x5x5xf32>
    %111 = vector.shape_cast %110 : vector<1x5x5xf32> to vector<5x5xf32>
    %112 = arith.truncf %111 : vector<5x5xf32> to vector<5x5xbf16>
    %cst_65 = arith.constant dense<0.000000e+00> : vector<32x5xf32>
    %113 = tpu.matmul %109, %112, %cst_65 {dimension_numbers = #tpu.dot_dimension_numbers<[1], [0], [0], [1], [0, 0, 1, 1], [], []>} : vector<32x5xbf16>, vector<5x5xbf16>, vector<32x5xf32> -> vector<32x5xf32>
    %c0_66 = arith.constant 0 : index
    %c0_67 = arith.constant 0 : index
    %114 = vector.load %arg10[%c0_66, %c0_67] : memref<64x208xbf16, #tpu.memory_space<vmem>>, vector<24x208xbf16>
    %115 = arith.truncf %108 : vector<32x24xf32> to vector<32x24xbf16>
    %cst_68 = arith.constant dense<0.000000e+00> : vector<32x208xf32>
    %116 = tpu.matmul %115, %114, %cst_68 {dimension_numbers = #tpu.dot_dimension_numbers<[1], [0], [0], [1], [0, 0, 1, 1], [], []>} : vector<32x24xbf16>, vector<24x208xbf16>, vector<32x208xf32> -> vector<32x208xf32>
    %117 = vector.extract_strided_slice %108 {offsets = [16, 0], sizes = [16, 24], strides = [1, 1]} : vector<32x24xf32> to vector<16x24xf32>
    %cst_69 = arith.constant 0.000000e+00 : f32
    %118 = vector.broadcast %cst_69 : f32 to vector<16x24xf32>
    %119 = arith.subf %118, %117 : vector<16x24xf32>
    %120 = vector.extract_strided_slice %108 {offsets = [0, 0], sizes = [16, 24], strides = [1, 1]} : vector<32x24xf32> to vector<16x24xf32>
    %121 = tpu.concatenate %119, %120 in 0 : vector<16x24xf32>, vector<16x24xf32> -> vector<32x24xf32>
    %c24_70 = arith.constant 24 : index
    %c0_71 = arith.constant 0 : index
    %122 = vector.load %arg10[%c24_70, %c0_71] : memref<64x208xbf16, #tpu.memory_space<vmem>>, vector<24x208xbf16>
    %123 = arith.truncf %121 : vector<32x24xf32> to vector<32x24xbf16>
    %cst_72 = arith.constant dense<0.000000e+00> : vector<32x208xf32>
    %124 = tpu.matmul %123, %122, %cst_72 {dimension_numbers = #tpu.dot_dimension_numbers<[1], [0], [0], [1], [0, 0, 1, 1], [], []>} : vector<32x24xbf16>, vector<24x208xbf16>, vector<32x208xf32> -> vector<32x208xf32>
    %125 = arith.addf %116, %124 : vector<32x208xf32>
    %c48_73 = arith.constant 48 : index
    %c0_74 = arith.constant 0 : index
    %126 = vector.load %arg10[%c48_73, %c0_74] : memref<64x208xbf16, #tpu.memory_space<vmem>>, vector<5x208xbf16>
    %127 = arith.truncf %113 : vector<32x5xf32> to vector<32x5xbf16>
    %cst_75 = arith.constant dense<0.000000e+00> : vector<32x208xf32>
    %128 = tpu.matmul %127, %126, %cst_75 {dimension_numbers = #tpu.dot_dimension_numbers<[1], [0], [0], [1], [0, 0, 1, 1], [], []>} : vector<32x5xbf16>, vector<5x208xbf16>, vector<32x208xf32> -> vector<32x208xf32>
    %129 = vector.extract_strided_slice %113 {offsets = [16, 0], sizes = [16, 5], strides = [1, 1]} : vector<32x5xf32> to vector<16x5xf32>
    %cst_76 = arith.constant 0.000000e+00 : f32
    %130 = vector.broadcast %cst_76 : f32 to vector<16x5xf32>
    %131 = arith.subf %130, %129 : vector<16x5xf32>
    %132 = vector.extract_strided_slice %113 {offsets = [0, 0], sizes = [16, 5], strides = [1, 1]} : vector<32x5xf32> to vector<16x5xf32>
    %133 = tpu.concatenate %131, %132 in 0 : vector<16x5xf32>, vector<16x5xf32> -> vector<32x5xf32>
    %c56 = arith.constant 56 : index
    %c0_77 = arith.constant 0 : index
    %134 = vector.load %arg10[%c56, %c0_77] : memref<64x208xbf16, #tpu.memory_space<vmem>>, vector<5x208xbf16>
    %135 = arith.truncf %133 : vector<32x5xf32> to vector<32x5xbf16>
    %cst_78 = arith.constant dense<0.000000e+00> : vector<32x208xf32>
    %136 = tpu.matmul %135, %134, %cst_78 {dimension_numbers = #tpu.dot_dimension_numbers<[1], [0], [0], [1], [0, 0, 1, 1], [], []>} : vector<32x5xbf16>, vector<5x208xbf16>, vector<32x208xf32> -> vector<32x208xf32>
    %137 = arith.addf %128, %136 : vector<32x208xf32>
    %c0_79 = arith.constant 0 : index
    %c0_80 = arith.constant 0 : index
    %138 = vector.load %arg11[%c0_79, %c0_80] : memref<256x208xbf16, #tpu.memory_space<vmem>>, vector<128x208xbf16>
    %139 = arith.truncf %105 : vector<32x128xf32> to vector<32x128xbf16>
    %cst_81 = arith.constant dense<0.000000e+00> : vector<32x208xf32>
    %140 = tpu.matmul %139, %138, %cst_81 {dimension_numbers = #tpu.dot_dimension_numbers<[1], [0], [0], [1], [0, 0, 1, 1], [], []>} : vector<32x128xbf16>, vector<128x208xbf16>, vector<32x208xf32> -> vector<32x208xf32>
    %141 = vector.extract_strided_slice %105 {offsets = [16, 0], sizes = [16, 128], strides = [1, 1]} : vector<32x128xf32> to vector<16x128xf32>
    %cst_82 = arith.constant 0.000000e+00 : f32
    %142 = vector.broadcast %cst_82 : f32 to vector<16x128xf32>
    %143 = arith.subf %142, %141 : vector<16x128xf32>
    %144 = vector.extract_strided_slice %105 {offsets = [0, 0], sizes = [16, 128], strides = [1, 1]} : vector<32x128xf32> to vector<16x128xf32>
    %145 = tpu.concatenate %143, %144 in 0 : vector<16x128xf32>, vector<16x128xf32> -> vector<32x128xf32>
    %c128 = arith.constant 128 : index
    %c0_83 = arith.constant 0 : index
    %146 = vector.load %arg11[%c128, %c0_83] : memref<256x208xbf16, #tpu.memory_space<vmem>>, vector<128x208xbf16>
    %147 = arith.truncf %145 : vector<32x128xf32> to vector<32x128xbf16>
    %cst_84 = arith.constant dense<0.000000e+00> : vector<32x208xf32>
    %148 = tpu.matmul %147, %146, %cst_84 {dimension_numbers = #tpu.dot_dimension_numbers<[1], [0], [0], [1], [0, 0, 1, 1], [], []>} : vector<32x128xbf16>, vector<128x208xbf16>, vector<32x208xf32> -> vector<32x208xf32>
    %149 = arith.addf %140, %148 : vector<32x208xf32>
    %150 = arith.mulf %137, %137 : vector<32x208xf32>
    %151 = arith.mulf %125, %125 : vector<32x208xf32>
    %152 = arith.addf %150, %151 : vector<32x208xf32>
    %153 = vector.extract_strided_slice %152 {offsets = [0, 0], sizes = [16, 208], strides = [1, 1]} : vector<32x208xf32> to vector<16x208xf32>
    %154 = vector.extract_strided_slice %152 {offsets = [16, 0], sizes = [16, 208], strides = [1, 1]} : vector<32x208xf32> to vector<16x208xf32>
    %155 = arith.addf %153, %154 : vector<16x208xf32>
    %156 = tpu.iota {dimensions = array<i32: 0>} : vector<16x1xi32>
    %c14_i32 = arith.constant 14 : i32
    %157 = vector.broadcast %c14_i32 : i32 to vector<16x1xi32>
    %158 = arith.cmpi sge, %156, %157 : vector<16x1xi32>
    %cst_85 = arith.constant 1.000000e+00 : f32
    %159 = vector.shape_cast %158 : vector<16x1xi1> to vector<16x1xi1>
    %160 = vector.broadcast %159 : vector<16x1xi1> to vector<16x208xi1>
    %161 = vector.broadcast %cst_85 : f32 to vector<16x208xf32>
    %162 = arith.select %160, %161, %155 : vector<16x208xi1>, vector<16x208xf32>
    %163 = tpu.reciprocal %162 : vector<16x208xf32> -> vector<16x208xf32>
    %164 = vector.extract_strided_slice %137 {offsets = [0, 0], sizes = [16, 208], strides = [1, 1]} : vector<32x208xf32> to vector<16x208xf32>
    %165 = vector.extract_strided_slice %137 {offsets = [16, 0], sizes = [16, 208], strides = [1, 1]} : vector<32x208xf32> to vector<16x208xf32>
    %166 = vector.extract_strided_slice %149 {offsets = [0, 0], sizes = [16, 208], strides = [1, 1]} : vector<32x208xf32> to vector<16x208xf32>
    %167 = vector.extract_strided_slice %149 {offsets = [16, 0], sizes = [16, 208], strides = [1, 1]} : vector<32x208xf32> to vector<16x208xf32>
    %168 = arith.mulf %164, %166 : vector<16x208xf32>
    %169 = arith.mulf %165, %167 : vector<16x208xf32>
    %170 = arith.addf %168, %169 : vector<16x208xf32>
    %171 = arith.mulf %170, %163 : vector<16x208xf32>
    %172 = arith.mulf %164, %167 : vector<16x208xf32>
    %173 = arith.mulf %165, %166 : vector<16x208xf32>
    %174 = arith.subf %172, %173 : vector<16x208xf32>
    %175 = arith.mulf %174, %163 : vector<16x208xf32>
    %176 = tpu.concatenate %171, %175 in 0 : vector<16x208xf32>, vector<16x208xf32> -> vector<32x208xf32>
    %c0_86 = arith.constant 0 : index
    %c0_87 = arith.constant 0 : index
    %177 = vector.load %arg12[%c0_86, %c0_87] : memref<416x128xbf16, #tpu.memory_space<vmem>>, vector<208x128xbf16>
    %178 = arith.truncf %176 : vector<32x208xf32> to vector<32x208xbf16>
    %cst_88 = arith.constant dense<0.000000e+00> : vector<32x128xf32>
    %179 = tpu.matmul %178, %177, %cst_88 {dimension_numbers = #tpu.dot_dimension_numbers<[1], [0], [0], [1], [0, 0, 1, 1], [], []>} : vector<32x208xbf16>, vector<208x128xbf16>, vector<32x128xf32> -> vector<32x128xf32>
    %180 = vector.extract_strided_slice %176 {offsets = [16, 0], sizes = [16, 208], strides = [1, 1]} : vector<32x208xf32> to vector<16x208xf32>
    %cst_89 = arith.constant 0.000000e+00 : f32
    %181 = vector.broadcast %cst_89 : f32 to vector<16x208xf32>
    %182 = arith.subf %181, %180 : vector<16x208xf32>
    %183 = vector.extract_strided_slice %176 {offsets = [0, 0], sizes = [16, 208], strides = [1, 1]} : vector<32x208xf32> to vector<16x208xf32>
    %184 = tpu.concatenate %182, %183 in 0 : vector<16x208xf32>, vector<16x208xf32> -> vector<32x208xf32>
    %c208_90 = arith.constant 208 : index
    %c0_91 = arith.constant 0 : index
    %185 = vector.load %arg12[%c208_90, %c0_91] : memref<416x128xbf16, #tpu.memory_space<vmem>>, vector<208x128xbf16>
    %186 = arith.truncf %184 : vector<32x208xf32> to vector<32x208xbf16>
    %cst_92 = arith.constant dense<0.000000e+00> : vector<32x128xf32>
    %187 = tpu.matmul %186, %185, %cst_92 {dimension_numbers = #tpu.dot_dimension_numbers<[1], [0], [0], [1], [0, 0, 1, 1], [], []>} : vector<32x208xbf16>, vector<208x128xbf16>, vector<32x128xf32> -> vector<32x128xf32>
    %188 = arith.addf %179, %187 : vector<32x128xf32>
    %c272 = arith.constant 272 : index
    %c0_93 = arith.constant 0 : index
    %189 = vector.load %arg3[%c272, %c0_93] : memref<288x128xbf16, #tpu.memory_space<vmem>>, vector<16x32xbf16>
    %190 = arith.truncf %188 : vector<32x128xf32> to vector<32x128xbf16>
    %cst_94 = arith.constant dense<0.000000e+00> : vector<16x128xf32>
    %191 = tpu.matmul %189, %190, %cst_94 {dimension_numbers = #tpu.dot_dimension_numbers<[1], [0], [0], [1], [0, 0, 1, 1], [], []>} : vector<16x32xbf16>, vector<32x128xbf16>, vector<16x128xf32> -> vector<16x128xf32>
    %c0_95 = arith.constant 0 : index
    %c0_96 = arith.constant 0 : index
    %192 = vector.load %arg8[%c0_95, %c0_96] : memref<128x512xbf16, #tpu.memory_space<vmem>>, vector<128x512xbf16>
    %193 = arith.truncf %191 : vector<16x128xf32> to vector<16x128xbf16>
    %cst_97 = arith.constant dense<0.000000e+00> : vector<16x512xf32>
    %194 = tpu.matmul %193, %192, %cst_97 {dimension_numbers = #tpu.dot_dimension_numbers<[1], [0], [0], [1], [0, 0, 1, 1], [], []>} : vector<16x128xbf16>, vector<128x512xbf16>, vector<16x512xf32> -> vector<16x512xf32>
    %c0_98 = arith.constant 0 : index
    %c0_99 = arith.constant 0 : index
    %195 = vector.load %arg9[%c0_98, %c0_99] : memref<1x512xf32, #tpu.memory_space<vmem>>, vector<1x512xf32>
    %196 = vector.broadcast %195 : vector<1x512xf32> to vector<16x512xf32>
    %197 = arith.addf %194, %196 : vector<16x512xf32>
    %c0_100 = arith.constant 0 : index
    %c0_101 = arith.constant 0 : index
    %c0_102 = arith.constant 0 : index
    %198 = vector.load %arg13[%c0_100, %c0_101, %c0_102] : memref<1x16x512xf32, #tpu.memory_space<vmem>>, vector<1x16x512xf32>
    %199 = vector.shape_cast %198 : vector<1x16x512xf32> to vector<16x512xf32>
    %200 = vector.shape_cast %197 : vector<16x512xf32> to vector<1x16x512xf32>
    tpu.vector_store %arg13[%c0_100, %c0_101, %c0_102], %200 {strides = array<i32>} : memref<1x16x512xf32, #tpu.memory_space<vmem>>, vector<1x16x512xf32>,
    return
  }
  func.func @transform_0(%arg0: i32) -> (i32, i32, i32) {
    %c0_i32 = arith.constant 0 : i32
    %c0_i32_0 = arith.constant 0 : i32
    %c0_i32_1 = arith.constant 0 : i32
    return %arg0, %c0_i32, %c0_i32_0 : i32, i32, i32
  }
  func.func @transform_1(%arg0: i32) -> (i32, i32, i32) {
    %c0_i32 = arith.constant 0 : i32
    %c0_i32_0 = arith.constant 0 : i32
    %c0_i32_1 = arith.constant 0 : i32
    return %arg0, %c0_i32, %c0_i32_0 : i32, i32, i32
  }
  func.func @transform_2(%arg0: i32) -> (i32, i32) {
    %c0_i32 = arith.constant 0 : i32
    %c0_i32_0 = arith.constant 0 : i32
    %c0_i32_1 = arith.constant 0 : i32
    return %c0_i32, %c0_i32_0 : i32, i32
  }
  func.func @transform_3(%arg0: i32) -> (i32, i32) {
    %c0_i32 = arith.constant 0 : i32
    %c0_i32_0 = arith.constant 0 : i32
    %c0_i32_1 = arith.constant 0 : i32
    return %c0_i32, %c0_i32_0 : i32, i32
  }
  func.func @transform_4(%arg0: i32) -> (i32, i32, i32) {
    %c0_i32 = arith.constant 0 : i32
    %c0_i32_0 = arith.constant 0 : i32
    %c0_i32_1 = arith.constant 0 : i32
    %c0_i32_2 = arith.constant 0 : i32
    return %c0_i32, %c0_i32_0, %c0_i32_1 : i32, i32, i32
  }
  func.func @transform_5(%arg0: i32) -> (i32, i32, i32) {
    %c0_i32 = arith.constant 0 : i32
    %c0_i32_0 = arith.constant 0 : i32
    %c0_i32_1 = arith.constant 0 : i32
    %c0_i32_2 = arith.constant 0 : i32
    return %c0_i32, %c0_i32_0, %c0_i32_1 : i32, i32, i32
  }
  func.func @transform_6(%arg0: i32) -> (i32, i32, i32) {
    %c0_i32 = arith.constant 0 : i32
    %c0_i32_0 = arith.constant 0 : i32
    %c0_i32_1 = arith.constant 0 : i32
    %c0_i32_2 = arith.constant 0 : i32
    return %c0_i32, %c0_i32_0, %c0_i32_1 : i32, i32, i32
  }
  func.func @transform_7(%arg0: i32) -> (i32, i32) {
    %c0_i32 = arith.constant 0 : i32
    %c0_i32_0 = arith.constant 0 : i32
    %c0_i32_1 = arith.constant 0 : i32
    return %c0_i32, %c0_i32_0 : i32, i32
  }
  func.func @transform_8(%arg0: i32) -> (i32, i32) {
    %c0_i32 = arith.constant 0 : i32
    %c0_i32_0 = arith.constant 0 : i32
    %c0_i32_1 = arith.constant 0 : i32
    return %c0_i32, %c0_i32_0 : i32, i32
  }
  func.func @transform_9(%arg0: i32) -> (i32, i32) {
    %c0_i32 = arith.constant 0 : i32
    %c0_i32_0 = arith.constant 0 : i32
    %c0_i32_1 = arith.constant 0 : i32
    return %c0_i32, %c0_i32_0 : i32, i32
  }
  func.func @transform_10(%arg0: i32) -> (i32, i32) {
    %c0_i32 = arith.constant 0 : i32
    %c0_i32_0 = arith.constant 0 : i32
    %c0_i32_1 = arith.constant 0 : i32
    return %c0_i32, %c0_i32_0 : i32, i32
  }
  func.func @transform_11(%arg0: i32) -> (i32, i32) {
    %c0_i32 = arith.constant 0 : i32
    %c0_i32_0 = arith.constant 0 : i32
    %c0_i32_1 = arith.constant 0 : i32
    return %c0_i32, %c0_i32_0 : i32, i32
  }
  func.func @transform_12(%arg0: i32) -> (i32, i32, i32) {
    %c0_i32 = arith.constant 0 : i32
    %c0_i32_0 = arith.constant 0 : i32
    %c0_i32_1 = arith.constant 0 : i32
    return %arg0, %c0_i32, %c0_i32_0 : i32, i32, i32
  }
}

</mosaic_0001>

<bundles_post_ra>
// kernel: tile.58
= control target key start
LH: loop header
LB: loop body
LE: loop exit
PB: predicated region body
PF: predicated region fallthrough
CT: control target
= control target key end

     0   :  { %s28_s0 = inlined_call_operand.vmem [shape: f32[32], index: 0, kind: input, shape index: {}]   ;;  %s29_s1 = inlined_call_operand.vmem [shape: f32[16,32], index: 1, kind: output, shape index: {}]  }
   0x1   :  { %v4_v0 = vld [vmem:[%s28_s0] ss:$0 sm:$0xff] }
   0x2   :  { %5 = vst [vmem:[%s29_s1] sm:$0xff] %v4_v0  ;;  %8 = vst [vmem:[%s29_s1 + $0x8] sm:$0xff] %v4_v0 }

// kernel: tile.59
= control target key start
LH: loop header
LB: loop body
LE: loop exit
PB: predicated region body
PF: predicated region fallthrough
CT: control target
= control target key end

     0   :  { %s62_s8 = smov 96   ;;  %vm3_vm0 = vcmask 261120   ;;  %s64_s15 = smov 64   ;;  %vm9_vm1 = vcmask 1048320   ;;  %vm15_vm2 = vcmask 785920   ;;  %vm21_vm3 = vcmask 523520   ;;  %s99_s0 = inlined_call_operand.vmem [shape: f32[16,32], index: 0, kind: input, shape index: {}]   ;;  %s100_s1 = inlined_call_operand.vmem [shape: f32[1,512], index: 1, kind: output, shape index: {}]  }
   0x1   :  { %v53_v0 = vld [vmem:[%s99_s0 + $0x3] ss:$4 sm:$0xf]   ;;  %v54_v1 = vld [vmem:[%s99_s0 + $0x2] ss:$4 sm:$0xf]  }
   0x2   :  { %7 = vrot.lane.b32.xlu0 %v53_v0, %s62_s8  ;;  %v55_v2 = vld [vmem:[%s99_s0 + $0x1] ss:$4 sm:$0xf]   ;;  %v2_v3 = vld [vmem:[%s99_s0] ss:$4 sm:$0xf]  }
   0x3   :  { %s63_s0 = smov 32   ;;  %4 = vst.msk [vmem:[#allocation0] ss:$8 sm:$0xf] %vm3_vm0, %v2_v3  }
   0x4   :  { %19 = vrot.lane.b32.xlu1 %v55_v2, %s63_s0 }
   0x6   :  { %13 = vrot.lane.b32.xlu0 %v54_v1, %s64_s15 }
  0x74   :  { %v8_v4 = vpop.permute.xlu0 %7  }
  0x75   :  { %10 = vst.msk [vmem:[#allocation0] ss:$8 sm:$0xf] %vm9_vm1, %v8_v4  }
  0x76   :  { %v20_v5 = vpop.permute.xlu1 %19  }
  0x78   :  { %v14_v6 = vpop.permute.xlu0 %13  }
  0x79   :  { %16 = vst.msk [vmem:[#allocation0] ss:$8 sm:$0xf] %vm15_vm2, %v14_v6  }
  0x7a   :  { %22 = vst.msk [vmem:[#allocation0] ss:$8 sm:$0xf] %vm21_vm3, %v20_v5  }
  0x81   :  { %v27_v7 = vld [vmem:[#allocation0] sm:$0x1]  ;;  %v32_v8 = vld [vmem:[#allocation0 + $0x8] sm:$0x1]  ;;  %v38_v9 = vld [vmem:[#allocation0 + $0x10] sm:$0x1] }
  0x82   :  { %30 = vst [vmem:[%s100_s1] sm:$0x1] %v27_v7  ;;  %56 = vst [vmem:[%s100_s1 + $0x1] sm:$0x1] %v32_v8  ;;  %v45_v10 = vld [vmem:[#allocation0 + $0x18] sm:$0x1] }
  0x83   :  { %57 = vst [vmem:[%s100_s1 + $0x2] sm:$0x1] %v38_v9  ;;  %58 = vst [vmem:[%s100_s1 + $0x3] sm:$0x1] %v45_v10 }

// kernel: cls_forward.1
= control target key start
LH: loop header
LB: loop body
LE: loop exit
PB: predicated region body
PF: predicated region fallthrough
CT: control target
= control target key end

     0   :  { %s4762_s21 = smov 0   ;;  %s5703_s0 = inlined_call_operand.vmem [shape: f32[2,16,512], index: 0, kind: input, shape index: {}]   ;;  %s5704_s1 = inlined_call_operand.vmem [shape: f32[2,5,5], index: 1, kind: input, shape index: {}]   ;;  %s5705_s2 = inlined_call_operand.vmem [shape: bf16[288,128], index: 2, kind: input, shape index: {}]   ;;  %s5706_s3 = inlined_call_operand.vmem [shape: bf16[512,128], index: 3, kind: input, shape index: {}]   ;;  %s5707_s4 = inlined_call_operand.vmem [shape: bf16[3,128,112], index: 4, kind: input, shape index: {}]   ;;  %s5708_s5 = inlined_call_operand.vmem [shape: bf16[3,112,96], index: 5, kind: input, shape index: {}]   ;;  %s5709_s6 = inlined_call_operand.vmem [shape: bf16[3,96,80], index: 6, kind: input, shape index: {}]   ;;  %s5710_s7 = inlined_call_operand.vmem [shape: bf16[128,512], index: 7, kind: input, shape index: {}]   ;;  %s5711_s8 = inlined_call_operand.vmem [shape: f32[1,512], index: 8, kind: input, shape index: {}]   ;;  %s5712_s9 = inlined_call_operand.vmem [shape: bf16[64,208], index: 9, kind: input, shape index: {}]   ;;  %s5713_s10 = inlined_call_operand.vmem [shape: bf16[256,208], index: 10, kind: input, shape index: {}]   ;;  %s5714_s11 = inlined_call_operand.vmem [shape: bf16[416,128], index: 11, kind: input, shape index: {}]   ;;  %s5715_s12 = inlined_call_operand.vmem [shape: f32[2,16,512], index: 12, kind: output, shape index: {}]  }
   0x1 LB: > { %s3708_s22 = sadd.s32 4294967295, %s4691_s21   ;;  %p3712_p0 = scmp.ge.s32.totalorder %s4691_s21, 1  ;;  %s4691_s21 = sphi %s4762_s21, %s22_s21  }
   0x2   : > { %p371_p1 = scmp.lt.s32.totalorder %s4691_s21, 3 }
   0x4   : > { %p372_p2 = pnand %p3712_p0, %p371_p1 }
   0x5   : > { %p417_p3 = scmp.lt.s32.totalorder (!%p372_p2), %s3708_s22, 1 }
   0x6   : > { %375 = sbr.rel (%p372_p2) target bundleno = 2882 (0xb42), region = 68 }
   0xb   : > { %v4428_v0 = vld [vmem:[%s5706_s3 + $0x78] sm:$0xff]   ;;  %v4432_v4 = vld [vmem:[%s5706_s3 + $0x70] sm:$0xff]   ;;  %v4436_v8 = vld [vmem:[%s5706_s3 + $0x68] sm:$0xff]   ;;  %s5717_s22 = smov (!%p417_p3, %s3708_s22), 1  ;;  %v4693_v39 = vmov 0.0   ;;  %vm4694_vm0 = vmmov 0   ;;  %v510_v61 = vlaneseq }
   0xc   : > { %v4429_v1 = vld [vmem:[%s5706_s3 + $0xf8] sm:$0xff]   ;;  %4050 = vmatprep.subr.bf16.mxu0 %v4428_v0  ;;  %v4433_v5 = vld [vmem:[%s5706_s3 + $0xf0] sm:$0xff]   ;;  %v4437_v9 = vld [vmem:[%s5706_s3 + $0xe8] sm:$0xff]   ;;  %s4048_s29 = sshll.u32 %s5717_s22, 6  ;;  %vm1212_vm3 = vcmask 916480   ;;  %vm1530_vm6 = vcmask 785408  }
   0xd   : > { %v4430_v2 = vld [vmem:[%s5706_s3 + $0x38] sm:$0xff]   ;;  %4072 = vmatprep.subr.bf16.mxu1 %v4429_v1  ;;  %v4434_v6 = vld [vmem:[%s5706_s3 + $0x30] sm:$0xff]   ;;  %v4438_v10 = vld [vmem:[%s5706_s3 + $0x28] sm:$0xff]   ;;  %s421_s20 = scalar_lea.vmem %s5703_s0, %s4048_s29  ;;  %v4948_v62 = vshrl.u32 %v510_v61, 7  ;;  %vm1778_vm7 = vcmask 1044480   ;;  %vm1917_vm8 = vcmask 1043456   ;;  %s430_s26 = scalar_lea.vmem %s5715_s12, %s4048_s29 }
   0xe   : > { %v4431_v3 = vld [vmem:[%s5706_s3 + $0xb8] sm:$0xff]   ;;  %4051 = vmatpush3.bf16.msra.mxu0 %v4430_v2  ;;  %v4435_v7 = vld [vmem:[%s5706_s3 + $0xb0] sm:$0xff]   ;;  %v4439_v11 = vld [vmem:[%s5706_s3 + $0xa8] sm:$0xff]   ;;  %vm1774_vm9 = vcmask 80896   ;;  %vm1853_vm10 = vcmask 654336   ;;  %vm1913_vm11 = vcmask 195584  }
   0xf   : > { %4073 = vmatpush3.bf16.msra.mxu1 %v4431_v3  ;;  %4052 = vmatprep.subr.bf16.mxu0 %v4432_v4  ;;  %v4440_v12 = vld [vmem:[%s5706_s3 + $0x60] sm:$0xff]   ;;  %v4444_v16 = vld [vmem:[%s5706_s3 + $0x58] sm:$0xff]   ;;  %v4448_v20 = vld [vmem:[%s5706_s3 + $0x50] sm:$0xff]   ;;  %v4954_v1 = vsub.s32 0, %v4948_v62  ;;  %vm1963_vm12 = vcmask 190464   ;;  %vm2127_vm13 = vcmask 1040384  }
  0x10   : > { %4074 = vmatprep.subr.bf16.mxu1 %v4433_v5  ;;  %v4441_v13 = vld [vmem:[%s5706_s3 + $0xe0] sm:$0xff]   ;;  %v4445_v17 = vld [vmem:[%s5706_s3 + $0xd8] sm:$0xff]   ;;  %v4449_v21 = vld [vmem:[%s5706_s3 + $0xd0] sm:$0xff]   ;;  %vm2128_vm14 = vcmask 1041408   ;;  %vm2120_vm15 = vcmask 23552   ;;  %s3715_s24 = sshll.u32 %s5717_s22, 3 }
  0x11   : > { %v4442_v14 = vld [vmem:[%s5706_s3 + $0x20] sm:$0xff]   ;;  %v4446_v18 = vld [vmem:[%s5706_s3 + $0x18] sm:$0xff]   ;;  %v4450_v22 = vld [vmem:[%s5706_s3 + $0x10] sm:$0xff]   ;;  %s425_s30 = scalar_lea.vmem %s5704_s1, %s3715_s24 }
  0x12   : > { %4053 = vmatpush3.bf16.msra.mxu0 %v4434_v6  ;;  %v4443_v15 = vld [vmem:[%s5706_s3 + $0xa0] sm:$0xff]   ;;  %v4447_v19 = vld [vmem:[%s5706_s3 + $0x98] sm:$0xff]   ;;  %v4451_v23 = vld [vmem:[%s5706_s3 + $0x90] sm:$0xff]  }
  0x13   : > { %4075 = vmatpush3.bf16.msra.mxu1 %v4435_v7  ;;  %4054 = vmatprep.subr.bf16.mxu0 %v4436_v8  ;;  %v4452_v24 = vld [vmem:[%s5706_s3 + $0x48] sm:$0xff]   ;;  %v4456_v28 = vld [vmem:[%s5706_s3 + $0x40] sm:$0xff]   ;;  %v435_v34 = vld [vmem:[%s421_s20 + $0x18] sm:$0xff] }
  0x14   : > { %4076 = vmatprep.subr.bf16.mxu1 %v4437_v9  ;;  %v4453_v25 = vld [vmem:[%s5706_s3 + $0xc8] sm:$0xff]   ;;  %v4457_v29 = vld [vmem:[%s5706_s3 + $0xc0] sm:$0xff]   ;;  %v439_v36 = vld [vmem:[%s421_s20 + $0x38] sm:$0xff] }
  0x15   : > { %v4454_v26 = vld [vmem:[%s5706_s3 + $0x8] sm:$0xff]   ;;  %v4458_v30 = vld [vmem:[%s5706_s3] sm:$0xff]   ;;  %v507_v40 = vpack.c.bf16 %v439_v36, %v435_v34  ;;  %v434_v42 = vld [vmem:[%s421_s20 + $0x10] sm:$0xff] }
  0x16   : > { %4055 = vmatpush3.bf16.msra.mxu0 %v4438_v10  ;;  %v4455_v27 = vld [vmem:[%s5706_s3 + $0x88] sm:$0xff]   ;;  %v4459_v31 = vld [vmem:[%s5706_s3 + $0x80] sm:$0xff]   ;;  %v438_v43 = vld [vmem:[%s421_s20 + $0x30] sm:$0xff] }
  0x17   : > { %4077 = vmatpush3.bf16.msra.mxu1 %v4439_v11  ;;  %4056 = vmatprep.subr.bf16.mxu0 %v4440_v12  ;;  %v433_v32 = vld [vmem:[%s421_s20 + $0x8] sm:$0xff]  ;;  %v432_v37 = vld [vmem:[%s421_s20] sm:$0xff]  ;;  %v506_v44 = vpack.c.bf16 %v438_v43, %v434_v42  ;;  %v4460_v45 = vld [vmem:[%s5707_s4 + $0x38] sm:$0xff]  }
  0x18   : > { %4078 = vmatprep.subr.bf16.mxu1 %v4441_v13  ;;  %v437_v33 = vld [vmem:[%s421_s20 + $0x28] sm:$0xff]  ;;  %v436_v38 = vld [vmem:[%s421_s20 + $0x20] sm:$0xff]  ;;  %779 = vmatprep.mubr.bf16.mxu1 %v507_v40  ;;  %v4462_v46 = vld [vmem:[%s5707_s4 + $0x78] sm:$0xff]  }
  0x19   : > { %v505_v35 = vpack.c.bf16 %v437_v33, %v433_v32  ;;  %v504_v41 = vpack.c.bf16 %v436_v38, %v432_v37  ;;  %v4461_v47 = vld [vmem:[%s5707_s4 + $0x30] sm:$0xff]   ;;  %v4463_v49 = vld [vmem:[%s5707_s4 + $0x28] sm:$0xff]   ;;  %v4465_v51 = vld [vmem:[%s5707_s4 + $0x20] sm:$0xff]  }
  0x1a   : > { %4057 = vmatpush3.bf16.msra.mxu0 %v4442_v14  ;;  %v4464_v48 = vld [vmem:[%s5707_s4 + $0x70] sm:$0xff]   ;;  %v4466_v50 = vld [vmem:[%s5707_s4 + $0x68] sm:$0xff]   ;;  %v4467_v52 = vld [vmem:[%s5707_s4 + $0x18] sm:$0xff]  }
  0x1b   : > { %4079 = vmatpush3.bf16.msra.mxu1 %v4443_v15  ;;  %4058 = vmatprep.subr.bf16.mxu0 %v4444_v16  ;;  %v4468_v53 = vld [vmem:[%s5707_s4 + $0x60] sm:$0xff]   ;;  %v4469_v54 = vld [vmem:[%s5707_s4 + $0x10] sm:$0xff]   ;;  %v4470_v55 = vld [vmem:[%s5707_s4 + $0x58] sm:$0xff]  }
  0x1c   : > { %4080 = vmatprep.subr.bf16.mxu1 %v4445_v17  ;;  %738 = vmatprep.mubr.bf16.mxu0 %v505_v35  ;;  %v4471_v56 = vld [vmem:[%s5707_s4 + $0x8] sm:$0xff]   ;;  %v4472_v57 = vld [vmem:[%s5707_s4 + $0x50] sm:$0xff]   ;;  %v4473_v58 = vld [vmem:[%s5707_s4] sm:$0xff]  }
  0x1d   : > { %v4474_v59 = vld [vmem:[%s5707_s4 + $0x48] sm:$0xff]   ;;  %v4475_v60 = vld [vmem:[%s5707_s4 + $0x40] sm:$0xff]   ;;  %v4486_v35 = vld [vmem:[%s5708_s5 + $0x98] sm:$0xff]  }
  0x1e   : > { %4059 = vmatpush3.bf16.msra.mxu0 %v4446_v18  ;;  %v508_v63 = vld [vmem:[%s5705_s2] sm:$0x1]  ;;  %v4485_v34 = vld [vmem:[%s5708_s5 + $0x68] sm:$0xff]   ;;  %v4488_v37 = vld [vmem:[%s5708_s5 + $0x90] sm:$0xff]  }
  0x1f   : > { %4081 = vmatpush3.bf16.msra.mxu1 %v4447_v19  ;;  %4060 = vmatprep.subr.bf16.mxu0 %v4448_v20  ;;  %v509_v0 = vunpack.c.l.bf16 %v508_v63  ;;  %v4484_v33 = vld [vmem:[%s5708_s5 + $0xa0] sm:$0xff]   ;;  %v4489_v38 = vld [vmem:[%s5708_s5 + $0x58] sm:$0xff]   ;;  %v4490_v40 = vld [vmem:[%s5708_s5 + $0x88] sm:$0xff]  }
  0x20   : > { %4082 = vmatprep.subr.bf16.mxu1 %v4449_v21  ;;  %v4487_v36 = vld [vmem:[%s5708_s5 + $0x60] sm:$0xff]   ;;  %v4493_v43 = vld [vmem:[%s5708_s5 + $0x48] sm:$0xff]  }
  0x21   : > { %v513_v5 = vrot.slane %v509_v0, %v4954_v1  ;;  %v4492_v42 = vld [vmem:[%s5708_s5 + $0x80] sm:$0xff]  }
  0x22   : > { %4061 = vmatpush3.bf16.msra.mxu0 %v4450_v22 }
  0x23   : > { %4083 = vmatpush3.bf16.msra.mxu1 %v4451_v23  ;;  %4062 = vmatprep.subr.bf16.mxu0 %v4452_v24  ;;  %v4476_v23 = vld [vmem:[%s5707_s4 + $0xb8] sm:$0xff]  }
  0x24   : > { %4084 = vmatprep.subr.bf16.mxu1 %v4453_v25  ;;  %v4477_v25 = vld [vmem:[%s5707_s4 + $0xb0] sm:$0xff]  }
  0x26   : > { %4063 = vmatpush3.bf16.msra.mxu0 %v4454_v26  ;;  %v4478_v26 = vld [vmem:[%s5707_s4 + $0xa8] sm:$0xff]  }
  0x27   : > { %4085 = vmatpush3.bf16.msra.mxu1 %v4455_v27  ;;  %4064 = vmatprep.subr.bf16.mxu0 %v4456_v28  ;;  %v4479_v27 = vld [vmem:[%s5707_s4 + $0xa0] sm:$0xff]   ;;  %v4480_v28 = vld [vmem:[%s5707_s4 + $0x98] sm:$0xff]  }
  0x28   : > { %4086 = vmatprep.subr.bf16.mxu1 %v4457_v29  ;;  %v4481_v29 = vld [vmem:[%s5707_s4 + $0x90] sm:$0xff]  }
  0x2a   : > { %4065 = vmatpush3.bf16.msra.mxu0 %v4458_v30  ;;  %v4482_v30 = vld [vmem:[%s5707_s4 + $0x88] sm:$0xff]  }
  0x2b   : > { %4087 = vmatpush3.bf16.msra.mxu1 %v4459_v31  ;;  %4192 = vmatprep.subr.bf16.mxu0 %v4693_v39  ;;  %v4483_v31 = vld [vmem:[%s5707_s4 + $0x80] sm:$0xff]  }
  0x2c   : > { %4212 = vmatprep.subr.bf16.mxu1 %v4693_v39 }
  0x2d   : > { %739 = vmatmul.mubr.bf16.vlgmr.msra.gmra.mxu0 %v504_v41  ;;  %v4491_v41 = vld [vmem:[%s5708_s5 + $0x50] sm:$0xff]  }
  0x2e   : > { %780 = vmatmul.mubr.bf16.vlgmr.msra.gmra.mxu1 %v506_v44  ;;  %4193 = vmatpush3.bf16.msra.mxu0 %v4462_v46  ;;  %v4494_v44 = vld [vmem:[%s5708_s5 + $0x78] sm:$0xff]   ;;  %v4496_v46 = vld [vmem:[%s5708_s5 + $0x70] sm:$0xff]  }
  0x2f   : > { %4213 = vmatpush3.bf16.msra.mxu1 %v4460_v45  ;;  %4194 = vmatprep.subr.bf16.mxu0 %v4693_v39  ;;  %v4495_v45 = vld [vmem:[%s5708_s5 + $0x40] sm:$0xff]  }
  0x30   : > { %4214 = vmatprep.subr.bf16.mxu1 %v4693_v39  ;;  %4228 = vmatprep.mubr.msk.bf16.mxu1 %vm4694_vm0, %v4693_v39 }
  0x31   : > { %4208 = vmatprep.mubr.msk.bf16.mxu0 %vm4694_vm0, %v4693_v39 }
  0x32   : > { %4195 = vmatpush3.bf16.msra.mxu0 %v4464_v48 }
  0x33   : > { %4215 = vmatpush3.bf16.msra.mxu1 %v4461_v47  ;;  %4196 = vmatprep.subr.bf16.mxu0 %v4693_v39  ;;  %v4497_v47 = vld [vmem:[%s5708_s5 + $0x38] sm:$0xff]  }
  0x34   : > { %4216 = vmatprep.subr.bf16.mxu1 %v4693_v39 }
  0x36   : > { %4197 = vmatpush3.bf16.msra.mxu0 %v4466_v50 }
  0x37   : > { %4217 = vmatpush3.bf16.msra.mxu1 %v4463_v49  ;;  %4198 = vmatprep.subr.bf16.mxu0 %v4693_v39 }
  0x38   : > { %4218 = vmatprep.subr.bf16.mxu1 %v4693_v39 }
  0x3a   : > { %4199 = vmatpush3.bf16.msra.mxu0 %v4468_v53 }
  0x3b   : > { %4219 = vmatpush3.bf16.msra.mxu1 %v4465_v51  ;;  %4200 = vmatprep.subr.bf16.mxu0 %v4693_v39 }
  0x3c   : > { %4220 = vmatprep.subr.bf16.mxu1 %v4693_v39 }
  0x3e   : > { %4201 = vmatpush3.bf16.msra.mxu0 %v4470_v55 }
  0x3f   : > { %4221 = vmatpush3.bf16.msra.mxu1 %v4467_v52  ;;  %4202 = vmatprep.subr.bf16.mxu0 %v4693_v39 }
  0x40   : > { %4222 = vmatprep.subr.bf16.mxu1 %v4693_v39 }
  0x42   : > { %4203 = vmatpush3.bf16.msra.mxu0 %v4472_v57 }
  0x43   : > { %4223 = vmatpush3.bf16.msra.mxu1 %v4469_v54  ;;  %4204 = vmatprep.subr.bf16.mxu0 %v4693_v39 }
  0x44   : > { %4224 = vmatprep.subr.bf16.mxu1 %v4693_v39 }
  0x46   : > { %4205 = vmatpush3.bf16.msra.mxu0 %v4474_v59 }
  0x47   : > { %4225 = vmatpush3.bf16.msra.mxu1 %v4471_v56  ;;  %4206 = vmatprep.subr.bf16.mxu0 %v4693_v39  ;;  %v1119_v56 = vld [vmem:[%s5705_s2 + $0x4] sm:$0x1] }
  0x48   : > { %4226 = vmatprep.subr.bf16.mxu1 %v4693_v39  ;;  %v1120_v57 = vunpack.c.l.bf16 %v1119_v56 }
  0x4a   : > { %4207 = vmatpush3.bf16.msra.mxu0 %v4475_v60  ;;  %v1124_v59 = vrot.slane %v1120_v57, %v4954_v1 }
  0x4b   : > { %4227 = vmatpush3.bf16.msra.mxu1 %v4473_v58  ;;  %4232 = vmatprep.subr.bf16.mxu0 %v4693_v39 }
  0x4c   : > { %4252 = vmatprep.subr.bf16.mxu1 %v4693_v39 }
  0xed   : > { %v4066_v2 = vpop.f32.mrf.mxu0 }
  0xee   : > { %v4088_v3 = vpop.f32.mrf.mxu1 }
  0xef   : > { %v4067_v4 = vpop.f32.mrf.mxu0 }
  0xf0   : > { %v4068_v6 = vadd.f32 %v4067_v4, %v4066_v2  ;;  %v4089_v7 = vpop.f32.mrf.mxu1 }
  0xf1   : > { %v4069_v8 = vpop.f32.mrf.mxu0  ;;  %v4090_v14 = vadd.f32 %v4089_v7, %v4088_v3 }
  0xf2   : > { %v4091_v9 = vpop.f32.mrf.mxu1  ;;  %v741_v11 = vadd.f32 %v4068_v6, %v513_v5 }
  0xf3   : > { %v4070_v10 = vpop.f32.mrf.mxu0 }
  0xf4   : > { %v4071_v12 = vadd.f32 %v4070_v10, %v4069_v8  ;;  %v4092_v13 = vpop.f32.mrf.mxu1  ;;  %v782_v17 = vadd.f32 %v4090_v14, %v741_v11 }
  0xf5   : > { %v4093_v16 = vadd.f32 %v4092_v13, %v4091_v9 }
  0xf6   : > { %v744_v15 = vadd.f32 %v4071_v12, %v513_v5 }
  0xf8   : > { %v785_v18 = vadd.f32 %v4093_v16, %v744_v15  ;;  %v4498_v16 = vld [vmem:[%s5708_s5 + $0x30] sm:$0xff]  }
  0xfa   : > { %v4957_v19 = vpack.c.bf16 %v785_v18, %v782_v17  ;;  %v4499_v18 = vld [vmem:[%s5708_s5 + $0x28] sm:$0xff]  }
  0xfc   : > { %4229 = vmatmul.mubr.bf16.vlgmr.msra.gmra.mxu1 %v4957_v19  ;;  %v825_v20 = vshll.u32 %v4957_v19, 16  ;;  %v823_v21 = vshrl.u32 %v4957_v19, 16  ;;  %v1026_v32 = vrot.slane %v4957_v19, 1 }
  0xfd   : > { %4266 = vmatprep.mubr.msk.bf16.mxu1 %vm4694_vm0, %v4693_v39  ;;  %4253 = vmatpush3.bf16.msra.mxu1 %v4485_v34  ;;  %v4514_v34 = vld [vmem:[%s5709_s6] sm:$0xff]  }
  0xfe   : > { %v827_v22 = vrot.slane %v825_v20, 1  ;;  %4254 = vmatprep.subr.bf16.mxu1 %v4693_v39  ;;  %v4500_v20 = vld [vmem:[%s5708_s5 + $0x20] sm:$0xff]  }
 0x100   : > { %v828_v24 = vor.u32 %v827_v22, %v823_v21  ;;  %v4501_v21 = vld [vmem:[%s5708_s5 + $0x18] sm:$0xff]   ;;  %v4502_v22 = vld [vmem:[%s5708_s5 + $0x10] sm:$0xff]  }
 0x101   : > { %4255 = vmatpush3.bf16.msra.mxu1 %v4487_v36  ;;  %v4516_v36 = vld [vmem:[%s5709_s6 + $0x30] sm:$0xff]  }
 0x102   : > { %4209 = vmatmul.mubr.bf16.vlgmr.msra.gmra.mxu0 %v828_v24  ;;  %4256 = vmatprep.subr.bf16.mxu1 %v4693_v39  ;;  %v4504_v24 = vld [vmem:[%s5708_s5] sm:$0xff]  }
 0x103   : > { %4233 = vmatpush3.bf16.msra.mxu0 %v4476_v23  ;;  %4248 = vmatprep.mubr.msk.bf16.mxu0 %vm4694_vm0, %v4693_v39  ;;  %v4503_v23 = vld [vmem:[%s5708_s5 + $0x8] sm:$0xff]  }
 0x104   : > { %4234 = vmatprep.subr.bf16.mxu0 %v4693_v39 }
 0x105   : > { %4257 = vmatpush3.bf16.msra.mxu1 %v4489_v38 }
 0x106   : > { %4258 = vmatprep.subr.bf16.mxu1 %v4693_v39 }
 0x107   : > { %4235 = vmatpush3.bf16.msra.mxu0 %v4477_v25  ;;  %v4505_v25 = vld [vmem:[%s5709_s6 + $0x28] sm:$0xff]  }
 0x108   : > { %4236 = vmatprep.subr.bf16.mxu0 %v4693_v39 }
 0x109   : > { %4259 = vmatpush3.bf16.msra.mxu1 %v4491_v41 }
 0x10a   : > { %4260 = vmatprep.subr.bf16.mxu1 %v4693_v39 }
 0x10b   : > { %4237 = vmatpush3.bf16.msra.mxu0 %v4478_v26  ;;  %v4507_v26 = vld [vmem:[%s5709_s6 + $0x58] sm:$0xff]  }
 0x10c   : > { %4238 = vmatprep.subr.bf16.mxu0 %v4693_v39 }
 0x10d   : > { %4261 = vmatpush3.bf16.msra.mxu1 %v4493_v43 }
 0x10e   : > { %4262 = vmatprep.subr.bf16.mxu1 %v4693_v39 }
 0x10f   : > { %4239 = vmatpush3.bf16.msra.mxu0 %v4479_v27  ;;  %v4506_v27 = vld [vmem:[%s5709_s6 + $0x20] sm:$0xff]  }
 0x110   : > { %4240 = vmatprep.subr.bf16.mxu0 %v4693_v39 }
 0x111   : > { %4263 = vmatpush3.bf16.msra.mxu1 %v4495_v45 }
 0x112   : > { %4264 = vmatprep.subr.bf16.mxu1 %v4693_v39 }
 0x113   : > { %4241 = vmatpush3.bf16.msra.mxu0 %v4480_v28  ;;  %v4508_v28 = vld [vmem:[%s5709_s6 + $0x18] sm:$0xff]  }
 0x114   : > { %4242 = vmatprep.subr.bf16.mxu0 %v4693_v39 }
 0x115   : > { %4265 = vmatpush3.bf16.msra.mxu1 %v4497_v47 }
 0x116   : > { %4270 = vmatprep.subr.bf16.mxu1 %v4693_v39 }
 0x117   : > { %4243 = vmatpush3.bf16.msra.mxu0 %v4481_v29  ;;  %v4509_v29 = vld [vmem:[%s5709_s6 + $0x50] sm:$0xff]  }
 0x118   : > { %4244 = vmatprep.subr.bf16.mxu0 %v4693_v39 }
 0x11b   : > { %4245 = vmatpush3.bf16.msra.mxu0 %v4482_v30  ;;  %v4510_v30 = vld [vmem:[%s5709_s6 + $0x10] sm:$0xff]  }
 0x11c   : > { %4246 = vmatprep.subr.bf16.mxu0 %v4693_v39 }
 0x11f   : > { %4247 = vmatpush3.bf16.msra.mxu0 %v4483_v31  ;;  %v4511_v31 = vld [vmem:[%s5709_s6 + $0x48] sm:$0xff]  }
 0x120   : > { %4288 = vmatprep.subr.bf16.mxu0 %v4693_v39 }
 0x122   : > { %4249 = vmatmul.mubr.bf16.vlgmr.msra.gmra.mxu0 %v1026_v32  ;;  %v4512_v32 = vld [vmem:[%s5709_s6 + $0x8] sm:$0xff]  }
 0x123   : > { %4302 = vmatprep.mubr.msk.bf16.mxu0 %vm4694_vm0, %v4693_v39  ;;  %4289 = vmatpush3.bf16.msra.mxu0 %v4484_v33  ;;  %v4513_v33 = vld [vmem:[%s5709_s6 + $0x40] sm:$0xff]  }
 0x124   : > { %4290 = vmatprep.subr.bf16.mxu0 %v4693_v39 }
 0x127   : > { %4291 = vmatpush3.bf16.msra.mxu0 %v4486_v35  ;;  %v4515_v35 = vld [vmem:[%s5709_s6 + $0x38] sm:$0xff]  }
 0x128   : > { %4292 = vmatprep.subr.bf16.mxu0 %v4693_v39 }
 0x12b   : > { %4293 = vmatpush3.bf16.msra.mxu0 %v4488_v37 }
 0x12c   : > { %4294 = vmatprep.subr.bf16.mxu0 %v4693_v39 }
 0x12f   : > { %4295 = vmatpush3.bf16.msra.mxu0 %v4490_v40 }
 0x130   : > { %4296 = vmatprep.subr.bf16.mxu0 %v4693_v39 }
 0x133   : > { %4297 = vmatpush3.bf16.msra.mxu0 %v4492_v42 }
 0x134   : > { %4298 = vmatprep.subr.bf16.mxu0 %v4693_v39 }
 0x137   : > { %4299 = vmatpush3.bf16.msra.mxu0 %v4494_v44 }
 0x138   : > { %4300 = vmatprep.subr.bf16.mxu0 %v4693_v39 }
 0x13b   : > { %4301 = vmatpush3.bf16.msra.mxu0 %v4496_v46  ;;  %v1447_v46 = vld [vmem:[%s5705_s2 + $0x8] sm:$0x1] }
 0x13c   : > { %4322 = vmatprep.subr.bf16.mxu0 %v4693_v39  ;;  %v1448_v47 = vunpack.c.l.bf16 %v1447_v46  ;;  %v4529_v46 = vld [vmem:[%s5705_s2 + $0x30] sm:$0xff]  }
 0x1bc   : > { %v1001_v48 = vpop.f32.mrf.mxu1 }
 0x1be   : > { %v4230_v49 = vpop.f32.mrf.mxu1 }
 0x1c0   : > { %v1004_v50 = vpop.f32.mrf.mxu1 }
 0x1c2   : > { %v912_v51 = vpop.f32.mrf.mxu0  ;;  %v4231_v52 = vpop.f32.mrf.mxu1 }
 0x1c3   : > { %v1002_v58 = vadd.f32 %v1001_v48, %v912_v51 }
 0x1c4   : > { %v4210_v53 = vpop.f32.mrf.mxu0 }
 0x1c6   : > { %v915_v54 = vpop.f32.mrf.mxu0 }
 0x1c7   : > { %v1005_v0 = vadd.f32 %v1004_v50, %v915_v54  ;;  %v1452_v50 = vrot.slane %v1448_v47, %v4954_v1 }
 0x1c8   : > { %v4211_v55 = vpop.f32.mrf.mxu0 }
 0x1e2   : > { %v1110_v60 = vpop.f32.mrf.mxu0 }
 0x1e3   : > { %v1117_v61 = vadd.f32 %v1110_v60, %v1002_v58 }
 0x1e4   : > { %v4250_v63 = vpop.f32.mrf.mxu0 }
 0x1e5   : > { %v1125_v2 = vadd.f32 %v1124_v59, %v1117_v61 }
 0x1e6   : > { %v1113_v3 = vpop.f32.mrf.mxu0 }
 0x1e7   : > { %v1118_v4 = vadd.f32 %v1113_v3, %v1005_v0  ;;  %v1129_v6 = vmul.f32 0.1, %v1125_v2  ;;  %vm1127_vm1 = vcmp.ge.f32.partialorder %v1125_v2, 0.0 }
 0x1e8   : > { %v4251_v5 = vpop.f32.mrf.mxu0 }
 0x1e9   : > { %v1126_v7 = vadd.f32 %v1124_v59, %v1118_v4  ;;  %v1131_v9 = vsel %vm1127_vm1, %v1125_v2, %v1129_v6  ;;  %v4517_v5 = vld [vmem:[%s5709_s6 + $0x88] sm:$0xff]   ;;  %vm2206_vm1 = vcmask 1042432  }
 0x1eb   : > { %vm1128_vm2 = vcmp.ge.f32.partialorder %v1126_v7, 0.0  ;;  %v1130_v8 = vmul.f32 0.1, %v1126_v7 }
 0x1ed   : > { %v1132_v10 = vsel %vm1128_vm2, %v1126_v7, %v1130_v8  ;;  %v4518_v7 = vld [vmem:[%s5709_s6 + $0x80] sm:$0xff]   ;;  %v4519_v8 = vld [vmem:[%s5709_s6 + $0x78] sm:$0xff]   ;;  %vm2049_vm2 = vcmask 130048  }
 0x1ee   : > { %v1147_v11 = vpack.c.bf16 %v1132_v10, %v1131_v9  ;;  %v4520_v9 = vld [vmem:[%s5709_s6 + $0x70] sm:$0xff]   ;;  %v4521_v10 = vld [vmem:[%s5709_s6 + $0x68] sm:$0xff]  }
 0x1f0   : > { %v1358_v12 = vrot.slane %v1147_v11, 1  ;;  %v1166_v13 = vshll.u32 %v1147_v11, 16  ;;  %v1164_v14 = vshrl.u32 %v1147_v11, 16 }
 0x1f2   : > { %4303 = vmatmul.mubr.msk.bf16.vlgmr.msra.gmra.mxu0 %vm1212_vm3, %v1358_v12  ;;  %v1168_v15 = vrot.slane %v1166_v13, 1  ;;  %v4525_v13 = vld [vmem:[%s5705_s2 + $0x50] sm:$0xff]  }
 0x1f3   : > { %4334 = vmatprep.mubr.msk.bf16.mxu0 %vm4694_vm0, %v4693_v39  ;;  %4323 = vmatpush3.bf16.msra.mxu0 %v4505_v25 }
 0x1f4   : > { %v1169_v17 = vor.u32 %v1168_v15, %v1164_v14  ;;  %4324 = vmatprep.subr.bf16.mxu0 %v4693_v39  ;;  %v4526_v14 = vld [vmem:[%s5705_s2 + $0x48] sm:$0xff]   ;;  %v4527_v15 = vld [vmem:[%s5705_s2 + $0x40] sm:$0xff]  }
 0x1f6   : > { %4267 = vmatmul.mubr.msk.bf16.vlgmr.msra.gmra.mxu1 %vm1212_vm3, %v1169_v17 }
 0x1f7   : > { %4271 = vmatpush3.bf16.msra.mxu1 %v4498_v16  ;;  %4284 = vmatprep.mubr.msk.bf16.mxu1 %vm4694_vm0, %v4693_v39  ;;  %v4528_v16 = vld [vmem:[%s5705_s2 + $0x38] sm:$0xff]  }
 0x1f8   : > { %4272 = vmatprep.subr.bf16.mxu1 %v4693_v39  ;;  %4325 = vmatpush3.bf16.msra.mxu0 %v4506_v27 }
 0x1f9   : > { %4326 = vmatprep.subr.bf16.mxu0 %v4693_v39 }
 0x1fb   : > { %4273 = vmatpush3.bf16.msra.mxu1 %v4499_v18 }
 0x1fc   : > { %4274 = vmatprep.subr.bf16.mxu1 %v4693_v39  ;;  %4327 = vmatpush3.bf16.msra.mxu0 %v4508_v28 }
 0x1fd   : > { %4328 = vmatprep.subr.bf16.mxu0 %v4693_v39 }
 0x1ff   : > { %4275 = vmatpush3.bf16.msra.mxu1 %v4500_v20 }
 0x200   : > { %4276 = vmatprep.subr.bf16.mxu1 %v4693_v39  ;;  %4329 = vmatpush3.bf16.msra.mxu0 %v4510_v30 }
 0x201   : > { %4330 = vmatprep.subr.bf16.mxu0 %v4693_v39 }
 0x203   : > { %4277 = vmatpush3.bf16.msra.mxu1 %v4501_v21 }
 0x204   : > { %4278 = vmatprep.subr.bf16.mxu1 %v4693_v39  ;;  %4331 = vmatpush3.bf16.msra.mxu0 %v4512_v32 }
 0x205   : > { %4332 = vmatprep.subr.bf16.mxu0 %v4693_v39 }
 0x207   : > { %4279 = vmatpush3.bf16.msra.mxu1 %v4502_v22 }
 0x208   : > { %4280 = vmatprep.subr.bf16.mxu1 %v4693_v39  ;;  %4333 = vmatpush3.bf16.msra.mxu0 %v4514_v34 }
 0x209   : > { %4360 = vmatprep.subr.bf16.mxu0 %v4693_v39 }
 0x20b   : > { %4281 = vmatpush3.bf16.msra.mxu1 %v4503_v23 }
 0x20c   : > { %4282 = vmatprep.subr.bf16.mxu1 %v4693_v39 }
 0x20f   : > { %4283 = vmatpush3.bf16.msra.mxu1 %v4504_v24 }
 0x210   : > { %4306 = vmatprep.subr.bf16.mxu1 %v4693_v39 }
 0x212   : > { %4285 = vmatmul.mubr.msk.bf16.vlgmr.msra.gmra.mxu1 %vm1212_vm3, %v1147_v11  ;;  %v4522_v11 = vld [vmem:[%s5709_s6 + $0x60] sm:$0xff]   ;;  %vm2199_vm3 = vcmask 39936  }
 0x213   : > { %4318 = vmatprep.mubr.msk.bf16.mxu1 %vm4694_vm0, %v4693_v39  ;;  %4307 = vmatpush3.bf16.msra.mxu1 %v4507_v26  ;;  %v1751_v26 = vld [vmem:[%s5705_s2 + $0xc] sm:$0x1] }
 0x214   : > { %4308 = vmatprep.subr.bf16.mxu1 %v4693_v39  ;;  %v1752_v27 = vunpack.c.l.bf16 %v1751_v26 }
 0x217   : > { %4309 = vmatpush3.bf16.msra.mxu1 %v4509_v29 }
 0x218   : > { %4310 = vmatprep.subr.bf16.mxu1 %v4693_v39 }
 0x21b   : > { %4311 = vmatpush3.bf16.msra.mxu1 %v4511_v31 }
 0x21c   : > { %4312 = vmatprep.subr.bf16.mxu1 %v4693_v39 }
 0x21f   : > { %4313 = vmatpush3.bf16.msra.mxu1 %v4513_v33  ;;  %v1756_v33 = vrot.slane %v1752_v27, %v4954_v1 }
 0x220   : > { %4314 = vmatprep.subr.bf16.mxu1 %v4693_v39 }
 0x223   : > { %4315 = vmatpush3.bf16.msra.mxu1 %v4515_v35 }
 0x224   : > { %4316 = vmatprep.subr.bf16.mxu1 %v4693_v39 }
 0x227   : > { %4317 = vmatpush3.bf16.msra.mxu1 %v4516_v36 }
 0x228   : > { %4338 = vmatprep.subr.bf16.mxu1 %v4693_v39 }
 0x2b2   : > { %v1438_v37 = vpop.f32.mrf.mxu0 }
 0x2b4   : > { %v4304_v38 = vpop.f32.mrf.mxu0 }
 0x2b6   : > { %v1250_v40 = vpop.f32.mrf.mxu1  ;;  %v1441_v41 = vpop.f32.mrf.mxu0 }
 0x2b8   : > { %v4268_v42 = vpop.f32.mrf.mxu1  ;;  %v4305_v43 = vpop.f32.mrf.mxu0 }
 0x2b9   : > { %v1759_v43 = vld [vmem:[%s5705_s2 + $0x14] sm:$0x3] }
 0x2ba   : > { %v1253_v44 = vpop.f32.mrf.mxu1 }
 0x2bc   : > { %v4269_v45 = vpop.f32.mrf.mxu1 }
 0x2bd   : > { %v4524_v45 = vld [vmem:[%s5705_s2 + $0x18] sm:$0xff]  }
 0x2d2   : > { %v1335_v48 = vpop.f32.mrf.mxu1 }
 0x2d3   : > { %v1336_v49 = vadd.f32 %v1335_v48, %v1250_v40 }
 0x2d4   : > { %v4286_v51 = vpop.f32.mrf.mxu1 }
 0x2d5   : > { %v1445_v52 = vadd.f32 %v1438_v37, %v1336_v49 }
 0x2d6   : > { %v1338_v53 = vpop.f32.mrf.mxu1 }
 0x2d7   : > { %v1453_v54 = vadd.f32 %v1452_v50, %v1445_v52  ;;  %v1339_v55 = vadd.f32 %v1338_v53, %v1253_v44 }
 0x2d8   : > { %v4287_v56 = vpop.f32.mrf.mxu1 }
 0x2d9   : > { %v1446_v57 = vadd.f32 %v1441_v41, %v1339_v55  ;;  %v1457_v58 = vmul.f32 0.1, %v1453_v54  ;;  %vm1455_vm4 = vcmp.ge.f32.partialorder %v1453_v54, 0.0  ;;  %v4523_v41 = vld [vmem:[%s5705_s2 + $0x20] ss:$0 sps:$4 sm:$0xff]  }
 0x2da   : > { %v1919_v44 = vsel %vm1917_vm8, %v4523_v41, 0 }
 0x2db   : > { %v1454_v59 = vadd.f32 %v1452_v50, %v1446_v57  ;;  %v1459_v61 = vsel %vm1455_vm4, %v1453_v54, %v1457_v58  ;;  %v4530_v57 = vld [vmem:[%s5705_s2 + $0x2c] ss:$0 sps:$4 sm:$0xff]  }
 0x2dc   : > { %v1988_v58 = vsel %vm1917_vm8, %v4530_v57, 0 }
 0x2dd   : > { %vm1456_vm5 = vcmp.ge.f32.partialorder %v1454_v59, 0.0  ;;  %v1458_v60 = vmul.f32 0.1, %v1454_v59 }
 0x2df   : > { %v1460_v63 = vsel %vm1456_vm5, %v1454_v59, %v1458_v60  ;;  %v4531_v59 = vld [vmem:[%s5705_s2 + $0x24] sm:$0xff]  }
 0x2e0   : > { %v1473_v0 = vpack.c.bf16 %v1460_v63, %v1459_v61 }
 0x2e2   : > { %4335 = vmatmul.mubr.msk.bf16.vlgmr.msra.gmra.mxu0 %vm1530_vm6, %v1473_v0  ;;  %v1490_v2 = vshll.u32 %v1473_v0, 16  ;;  %v1488_v3 = vshrl.u32 %v1473_v0, 16  ;;  %v1668_v12 = vrot.slane %v1473_v0, 1 }
 0x2e3   : > { %4370 = vmatprep.mubr.msk.bf16.mxu0 %vm4694_vm0, %v4693_v39  ;;  %4361 = vmatpush3.bf16.msra.mxu0 %v4525_v13 }
 0x2e4   : > { %v1492_v4 = vrot.slane %v1490_v2, 1  ;;  %4362 = vmatprep.subr.bf16.mxu0 %v4693_v39 }
 0x2e6   : > { %v1493_v6 = vor.u32 %v1492_v4, %v1488_v3 }
 0x2e7   : > { %4363 = vmatpush3.bf16.msra.mxu0 %v4526_v14 }
 0x2e8   : > { %4319 = vmatmul.mubr.msk.bf16.vlgmr.msra.gmra.mxu1 %vm1530_vm6, %v1493_v6  ;;  %4364 = vmatprep.subr.bf16.mxu0 %v4693_v39 }
 0x2e9   : > { %4339 = vmatpush3.bf16.msra.mxu1 %v4517_v5  ;;  %4350 = vmatprep.mubr.msk.bf16.mxu1 %vm4694_vm0, %v4693_v39 }
 0x2ea   : > { %4340 = vmatprep.subr.bf16.mxu1 %v4693_v39 }
 0x2eb   : > { %4365 = vmatpush3.bf16.msra.mxu0 %v4527_v15  ;;  %v4695_v15 = vmov 65535  }
 0x2ec   : > { %4366 = vmatprep.subr.bf16.mxu0 %v4693_v39 }
 0x2ed   : > { %4341 = vmatpush3.bf16.msra.mxu1 %v4518_v7 }
 0x2ee   : > { %4342 = vmatprep.subr.bf16.mxu1 %v4693_v39 }
 0x2ef   : > { %4367 = vmatpush3.bf16.msra.mxu0 %v4528_v16  ;;  %v2129_v16 = vsel %vm2127_vm13, 4294967295, %v4695_v15 }
 0x2f0   : > { %4368 = vmatprep.subr.bf16.mxu0 %v4693_v39 }
 0x2f1   : > { %4343 = vmatpush3.bf16.msra.mxu1 %v4519_v8 }
 0x2f2   : > { %4344 = vmatprep.subr.bf16.mxu1 %v4693_v39 }
 0x2f3   : > { %4369 = vmatpush3.bf16.msra.mxu0 %v4529_v46 }
 0x2f4   : > { %4382 = vmatprep.subr.bf16.mxu0 %v4693_v39 }
 0x2f5   : > { %4345 = vmatpush3.bf16.msra.mxu1 %v4520_v9 }
 0x2f6   : > { %4346 = vmatprep.subr.bf16.mxu1 %v4693_v39 }
 0x2f9   : > { %4347 = vmatpush3.bf16.msra.mxu1 %v4521_v10 }
 0x2fa   : > { %4348 = vmatprep.subr.bf16.mxu1 %v4693_v39 }
 0x2fd   : > { %4349 = vmatpush3.bf16.msra.mxu1 %v4522_v11 }
 0x2fe   : > { %4354 = vmatprep.subr.bf16.mxu1 %v4693_v39 }
 0x300   : > { %4351 = vmatmul.mubr.msk.bf16.vlgmr.msra.gmra.mxu1 %vm1530_vm6, %v1668_v12 }
 0x301   : > { %4356 = vmatprep.mubr.msk.bf16.mxu1 %vm4694_vm0, %v4693_v39 }
 0x3a2   : > { %v1647_v17 = vpop.f32.mrf.mxu0 }
 0x3a4   : > { %v4336_v18 = vpop.f32.mrf.mxu0 }
 0x3a5   : > { %v4532_v18 = vld [vmem:[%s5705_s2 + $0x68] sm:$0xff]  }
 0x3a6   : > { %v1650_v20 = vpop.f32.mrf.mxu0 }
 0x3a8   : > { %v1568_v21 = vpop.f32.mrf.mxu1  ;;  %v4337_v22 = vpop.f32.mrf.mxu0 }
 0x3a9   : > { %v1648_v29 = vadd.f32 %v1647_v17, %v1568_v21  ;;  %v2130_v17 = vsel %vm2128_vm14, %v2129_v16, 0  ;;  %v4534_v21 = vld [vmem:[%s5705_s2 + $0x58] sm:$0xff]   ;;  %v4535_v22 = vld [vmem:[%s5705_s2 + $0x60] sm:$0xff]  }
 0x3aa   : > { %v4320_v23 = vpop.f32.mrf.mxu1 }
 0x3ab   : > { %v4536_v23 = vld [vmem:[%s5705_s2 + $0x78] sm:$0xff]  }
 0x3ac   : > { %v1571_v24 = vpop.f32.mrf.mxu1 }
 0x3ad   : > { %v1651_v31 = vadd.f32 %v1650_v20, %v1571_v24  ;;  %v2207_v20 = vsel %vm2128_vm14, 4294967295, %v4695_v15 }
 0x3ae   : > { %v4321_v25 = vpop.f32.mrf.mxu1  ;;  %v5257_v24 = vsel %vm2206_vm1, %v2207_v20, 0 }
 0x3af   : > { %v2187_v25 = vld [vmem:[%s425_s30] sm:$0x1f] }
 0x3b0   : > { %v2188_v26 = vpack.c.bf16 %v2187_v25, %v2187_v25  ;;  %v4560_v25 = vld [vmem:[%s5713_s10 + $0xe4] ss:$8 sps:$4 sm:$0xff]  }
 0x3b2   : > { %v2210_v27 = vand.u32 %v5257_v24, %v2188_v26  ;;  %v4563_v26 = vld [vmem:[%s5713_s10 + $0x64] ss:$8 sps:$4 sm:$0xff]  }
 0x3c0   : > { %v1742_v28 = vpop.f32.mrf.mxu1 }
 0x3c1   : > { %v1749_v32 = vadd.f32 %v1742_v28, %v1648_v29  ;;  %v4537_v28 = vld [vmem:[%s5705_s2 + $0x80] sm:$0xff]  }
 0x3c2   : > { %v4352_v30 = vpop.f32.mrf.mxu1 }
 0x3c3   : > { %v1757_v37 = vadd.f32 %v1756_v33, %v1749_v32 }
 0x3c4   : > { %v1745_v34 = vpop.f32.mrf.mxu1 }
 0x3c5   : > { %v1750_v35 = vadd.f32 %v1745_v34, %v1651_v31 }
 0x3c6   : > { %v4353_v36 = vpop.f32.mrf.mxu1 }
 0x3c7   : > { %v1758_v38 = vadd.f32 %v1756_v33, %v1750_v35 }
 0x3c9   : > { %v1773_v40 = vpack.c.bf16 %v1758_v38, %v1757_v37  ;;  %v4533_v37 = vld [vmem:[%s5705_s2 + $0x70] sm:$0xff]   ;;  %v2270_v38 = vld [vmem:[%s5712_s9 + $0x28] sm:$0xff] }
 0x3ca   : > { %v3931_v41 = vcombine.high %v2270_v38, %v2270_v38 }
 0x3cb   : > { %v1780_v42 = vsel %vm1778_vm7, %v1773_v40, 0  ;;  %v2263_v40 = vld [vmem:[%s5712_s9 + $0x10] sm:$0xff] }
 0x3cc   : > { %4355 = vmatpush3.bf16.msra.mxu1 %v1780_v42  ;;  %v3938_v42 = vcombine.high %v2263_v40, %v2263_v40 }
 0x3cd   : > { %4374 = vmatprep.subr.bf16.mxu1 %v4693_v39 }
 0x3cf   : > { %4357 = vmatmul.mubr.msk.bf16.vlgmr.msra.gmra.mxu1 %vm1774_vm9, %v1759_v43  ;;  %v3930_v43 = vcombine.low %v2270_v38, %v2270_v38  ;;  %v4578_v38 = vld [vmem:[%s5713_s10 + $0xb4] ss:$8 sps:$4 sm:$0xff]  }
 0x3d0   : > { %4375 = vmatpush3.bf16.msra.mxu1 %v1919_v44  ;;  %4378 = vmatprep.mubr.msk.bf16.mxu1 %vm4694_vm0, %v4693_v39  ;;  %v3937_v44 = vcombine.low %v2263_v40, %v2263_v40  ;;  %v4581_v40 = vld [vmem:[%s5713_s10 + $0x34] ss:$8 sps:$4 sm:$0xff]  }
 0x3d1   : > { %4376 = vmatprep.subr.bf16.mxu1 %v4693_v39 }
 0x3d2   : > { %v2371_v46 = vsel %vm1917_vm8, %v3937_v44, 0  ;;  %v4587_v44 = vld [vmem:[%s5713_s10 + $0x24] ss:$8 sps:$4 sm:$0xff]  }
 0x3d4   : > { %4377 = vmatpush3.bf16.msra.mxu1 %v4524_v45  ;;  %v2294_v45 = vsel %vm1917_vm8, %v3930_v43, 0  ;;  %v4584_v43 = vld [vmem:[%s5713_s10 + $0xa4] ss:$8 sps:$4 sm:$0xff]  }
 0x3d5   : > { %4390 = vmatprep.subr.bf16.mxu1 %v4957_v19 }
 0x48f   : > { %v1816_v47 = vpop.f32.mrf.mxu1 }
 0x490   : > { %v1822_v48 = vpack.c.bf16 %v1816_v47, %v1816_v47  ;;  %v4544_v47 = vld [vmem:[%s5712_s9 + $0x1c] ss:$8 sps:$4 sm:$0xff]  }
 0x491   : > { %v4358_v49 = vpop.f32.mrf.mxu1 }
 0x492   : > { %4371 = vmatmul.mubr.msk.bf16.vlgmr.msra.gmra.mxu0 %vm1853_vm10, %v1822_v48  ;;  %v4547_v48 = vld [vmem:[%s5712_s9 + $0x4] ss:$8 sps:$4 sm:$0xff]   ;;  %v4542_v49 = vld [vmem:[%s5712_s9 + $0x18] ss:$8 sps:$4 sm:$0xff]  }
 0x493   : > { %v1819_v50 = vpop.f32.mrf.mxu1  ;;  %4386 = vmatprep.mubr.msk.bf16.mxu0 %vm4694_vm0, %v4693_v39  ;;  %4383 = vmatpush3.bf16.msra.mxu0 %v1988_v58 }
 0x494   : > { %4384 = vmatprep.subr.bf16.mxu0 %v4693_v39  ;;  %v4545_v50 = vld [vmem:[%s5712_s9] ss:$8 sps:$4 sm:$0xff]  }
 0x495   : > { %v4359_v51 = vpop.f32.mrf.mxu1 }
 0x496   : > { %v4696_v51 = vmov 0  }
 0x497   : > { %4385 = vmatpush3.bf16.msra.mxu0 %v4531_v59 }
 0x552   : > { %v1891_v52 = vpop.f32.mrf.mxu0 }
 0x553   : > { %v1897_v53 = vpack.c.bf16 %v1891_v52, %v1891_v52  ;;  %v2434_v52 = vld [vmem:[%s5712_s9 + $0x38] sm:$0x77] }
 0x554   : > { %v4372_v54 = vpop.f32.mrf.mxu0 }
 0x555   : > { %4379 = vmatmul.mubr.msk.bf16.vlgmr.msra.gmra.mxu1 %vm1913_vm11, %v1897_v53  ;;  %v2429_v53 = vld [vmem:[%s5712_s9 + $0x30] sm:$0x77]  ;;  %v3943_v54 = vcombine.high %v2434_v52, %v2434_v52 }
 0x556   : > { %4391 = vmatpush3.bf16.msra.mxu1 %v4957_v19  ;;  %v1894_v55 = vpop.f32.mrf.mxu0  ;;  %v1898_v19 = vld [vmem:[%s5705_s2 + $0x10] sm:$0x1]  ;;  %4392 = vmatprep.mubr.msk.bf16.mxu1 %vm2049_vm2, %v4534_v21 }
 0x557   : > { %v1899_v60 = vunpack.c.l.bf16 %v1898_v19  ;;  %4402 = vmatprep.subr.bf16.mxu1 %v2210_v27  ;;  %v3947_v55 = vcombine.high %v2429_v53, %v2429_v53  ;;  %v4552_v21 = vld [vmem:[%s5713_s10 + $0xf0] ss:$8 sps:$4 sm:$0xff]  }
 0x558   : > { %v4373_v56 = vpop.f32.mrf.mxu0 }
 0x559   : > { %v1903_v61 = vrot.slane %v1899_v60, %v4954_v1  ;;  %v2451_v56 = vand.u32 %v3943_v54, %v5257_v24  ;;  %v2518_v57 = vand.u32 %v3947_v55, %v5257_v24  ;;  %v4594_v54 = vld [vmem:[%s5713_s10 + $0x80] ss:$8 sps:$4 sm:$0xff]  }
 0x55a   : > { %v4597_v55 = vld [vmem:[%s5713_s10] ss:$8 sps:$4 sm:$0xff]  }
 0x55d   : > { %4393 = vmatmul.mubr.msk.bf16.vlgmr.msra.gmra.mxu1 %vm2049_vm2, %v4535_v22  ;;  %v4555_v22 = vld [vmem:[%s5713_s10 + $0x70] ss:$8 sps:$4 sm:$0xff]  }
 0x55e   : > { %4404 = vmatprep.mubr.msk.bf16.mxu1 %vm2199_vm3, %v4536_v23  ;;  %4403 = vmatpush3.bf16.msra.mxu1 %v2210_v27  ;;  %v4558_v27 = vld [vmem:[%s5713_s10 + $0xe0] ss:$8 sps:$4 sm:$0xff]  }
 0x55f   : > { %3939 = vmatprep.subr.msk.bf16.mxu1 %vm1917_vm8, %v3938_v42  ;;  %v4579_v42 = vld [vmem:[%s5713_s10 + $0x30] ss:$8 sps:$4 sm:$0xff]  }
 0x565   : > { %4405 = vmatmul.mubr.msk.bf16.vlgmr.msra.gmra.mxu1 %vm2199_vm3, %v4537_v28  ;;  %v4561_v28 = vld [vmem:[%s5713_s10 + $0x60] ss:$8 sps:$4 sm:$0xff]  }
 0x566   : > { %2389 = vmatpush1.bf16.msra.mxu1 %v2371_v46  ;;  %2408 = vmatprep.mubr.bf16.mxu1 %v4696_v51  ;;  %v4585_v46 = vld [vmem:[%s5713_s10 + $0x20] ss:$8 sps:$4 sm:$0xff]  }
 0x567   : > { %2390 = vmatprep.subr.bf16.mxu1 %v4547_v48  ;;  %v4593_v48 = vld [vmem:[%s5713_s10 + $0x14] ss:$8 sps:$4 sm:$0xff]  }
 0x56a   : > { %2391 = vmatpush1.bf16.msra.mxu1 %v4545_v50  ;;  %v4591_v50 = vld [vmem:[%s5713_s10 + $0x10] ss:$8 sps:$4 sm:$0xff]  }
 0x56b   : > { %2534 = vmatprep.subr.bf16.mxu1 %v2518_v57 }
 0x615   : > { %v1955_v63 = vpop.f32.mrf.mxu1 }
 0x616   : > { %v1956_v0 = vadd.f32 %v1955_v63, %v1903_v61  ;;  %v3942_v63 = vcombine.low %v2434_v52, %v2434_v52  ;;  %v4596_v52 = vld [vmem:[%s5713_s10 + $0x84] ss:$8 sps:$4 sm:$0xff]  }
 0x617   : > { %v4380_v2 = vpop.f32.mrf.mxu1 }
 0x618   : > { %v1961_v3 = vmul.f32 1.442695, %v1956_v0  ;;  %v3946_v0 = vcombine.low %v2429_v53, %v2429_v53  ;;  %v4599_v53 = vld [vmem:[%s5713_s10 + $0x4] ss:$8 sps:$4 sm:$0xff]  }
 0x619   : > { %v1958_v4 = vpop.f32.mrf.mxu1 }
 0x61a   : > { %4675 = vpow2.f32 %v1961_v3 }
 0x61b   : > { %v4381_v5 = vpop.f32.mrf.mxu1 }
 0x61d   : > { %v5302_v58 = vpop.f32.mrf.mxu1 }
 0x61f   : > { %v5304_v59 = vpop.f32.mrf.mxu1 }
 0x621   : > { %v5306_v60 = vpop.f32.mrf.mxu1 }
 0x622   : > { %v2592_v57 = vsub.f32 0.0, %v5306_v60 }
 0x623   : > { %v5308_v3 = vpop.f32.mrf.mxu1 }
 0x627   : > { %v4676_v6 = vpop.eup %4675 }
 0x628   : > { %v1964_v7 = vsel %vm1963_vm12, %v4676_v6, 0.0 }
 0x629   : > { %v1965_v8 = vrot.slane %v1964_v7, 4 }
 0x62b   : > { %v1966_v9 = vadd.f32 %v1965_v8, %v1964_v7 }
 0x62d   : > { %v1967_v10 = vrot.slane %v1966_v9, 2 }
 0x62f   : > { %v1968_v11 = vadd.f32 %v1967_v10, %v1966_v9  ;;  %v2448_v9 = vand.u32 %v3942_v63, %v5257_v24  ;;  %v2515_v10 = vand.u32 %v3946_v0, %v5257_v24  ;;  %v2590_v63 = vpack.c.bf16 %v5306_v60, %v5302_v58  ;;  %v4600_v0 = vld [vmem:[%s5714_s11 + $0x38] sm:$0xff]   ;;  %v4604_v60 = vld [vmem:[%s5714_s11 + $0x28] sm:$0xff]  }
 0x631   : > { %v1969_v12 = vrot.slane %v1968_v11, 1 }
 0x633   : > { %v1970_v13 = vadd.f32 %v1969_v12, %v1968_v11  ;;  %v4406_v11 = vpop.f32.mrf.mxu1  ;;  %v4554_v12 = vld [vmem:[%s5713_s10 + $0xf4] ss:$8 sps:$4 sm:$0xff]  }
 0x635   : > { %v1974_v14 = vpack.c.bf16 %v1970_v13, %v1970_v13  ;;  %v4557_v13 = vld [vmem:[%s5713_s10 + $0x74] ss:$8 sps:$4 sm:$0xff]  }
 0x637   : > { %4387 = vmatmul.mubr.msk.bf16.vlgmr.msra.gmra.mxu0 %vm1913_vm11, %v1974_v14  ;;  %v2246_v14 = vpop.f32.mrf.mxu1 }
 0x638   : > { %4398 = vmatprep.mubr.msk.bf16.mxu0 %vm2120_vm15, %v4532_v18 }
 0x639   : > { %v4407_v16 = vpop.f32.mrf.mxu1 }
 0x63a   : > { %v2433_v18 = vsub.f32 0.0, %v4407_v16 }
 0x63b   : > { %v2249_v20 = vpop.f32.mrf.mxu1 }
 0x63c   : > { %v2430_v24 = vpack.c.bf16 %v2249_v20, %v2246_v14  ;;  %v4616_v14 = vld [vmem:[%s5714_s11 + $0x60] sm:$0xff]   ;;  %v4621_v20 = vld [vmem:[%s5714_s11 + $0xb8] sm:$0xff]  }
 0x6f7   : > { %v2024_v29 = vpop.f32.mrf.mxu0 }
 0x6f8   : > { %v2033_v30 = vrot.slane %v2024_v29, %v4954_v1  ;;  %v4566_v29 = vld [vmem:[%s5713_s10 + $0xd4] ss:$8 sps:$4 sm:$0xff]  }
 0x6f9   : > { %v4388_v31 = vpop.f32.mrf.mxu0 }
 0x6fa   : > { %v2034_v32 = vsub.f32 %v4676_v6, %v2033_v30  ;;  %v4569_v30 = vld [vmem:[%s5713_s10 + $0x54] ss:$8 sps:$4 sm:$0xff]   ;;  %v4564_v31 = vld [vmem:[%s5713_s10 + $0xd0] ss:$8 sps:$4 sm:$0xff]  }
 0x6fb   : > { %v2027_v33 = vpop.f32.mrf.mxu0 }
 0x6fc   : > { %v2109_v34 = vpack.c.bf16 %v2034_v32, %v2034_v32  ;;  %v4567_v32 = vld [vmem:[%s5713_s10 + $0x50] ss:$8 sps:$4 sm:$0xff]   ;;  %v2431_v33 = vpack.c.bf16 %v4407_v16, %v4406_v11 }
 0x6fd   : > { %v4389_v35 = vpop.f32.mrf.mxu0  ;;  %v4618_v16 = vld [vmem:[%s5714_s11 + $0x58] sm:$0xff]  }
 0x6fe   : > { %v2132_v36 = vand.u32 %v2130_v17, %v2109_v34  ;;  %v2432_v17 = vsub.f32 0.0, %v4406_v11  ;;  %v4572_v34 = vld [vmem:[%s5713_s10 + $0xc4] ss:$8 sps:$4 sm:$0xff]   ;;  %v4613_v11 = vld [vmem:[%s5714_s11 + $0x70] sm:$0xff]  }
 0x6ff   : > { %v4575_v35 = vld [vmem:[%s5713_s10 + $0x44] ss:$8 sps:$4 sm:$0xff]  }
 0x700   : > { %4396 = vmatprep.subr.bf16.mxu0 %v2132_v36  ;;  %v2435_v23 = vpack.c.bf16 %v2433_v18, %v2432_v17  ;;  %v4619_v17 = vld [vmem:[%s5714_s11 + $0xc0] sm:$0xff]   ;;  %v4620_v18 = vld [vmem:[%s5714_s11 + $0x50] sm:$0xff]  }
 0x701   : > { %4397 = vmatpush3.bf16.msra.mxu0 %v2132_v36  ;;  %v4570_v36 = vld [vmem:[%s5713_s10 + $0xc0] ss:$8 sps:$4 sm:$0xff]  }
 0x702   : > { %3932 = vmatprep.subr.msk.bf16.mxu0 %vm1917_vm8, %v3931_v41  ;;  %v4576_v41 = vld [vmem:[%s5713_s10 + $0xb0] ss:$8 sps:$4 sm:$0xff]  }
 0x704   : > { %4399 = vmatmul.mubr.msk.bf16.vlgmr.msra.gmra.mxu0 %vm2120_vm15, %v4533_v37  ;;  %v4573_v37 = vld [vmem:[%s5713_s10 + $0x40] ss:$8 sps:$4 sm:$0xff]  }
 0x705   : > { %2312 = vmatpush1.bf16.msra.mxu0 %v2294_v45  ;;  %2331 = vmatprep.mubr.bf16.mxu0 %v4696_v51  ;;  %v4582_v45 = vld [vmem:[%s5713_s10 + $0xa0] ss:$8 sps:$4 sm:$0xff]  }
 0x706   : > { %2313 = vmatprep.subr.bf16.mxu0 %v4544_v47  ;;  %v4590_v47 = vld [vmem:[%s5713_s10 + $0x94] ss:$8 sps:$4 sm:$0xff]  }
 0x709   : > { %2314 = vmatpush1.bf16.msra.mxu0 %v4542_v49  ;;  %v4588_v49 = vld [vmem:[%s5713_s10 + $0x90] ss:$8 sps:$4 sm:$0xff]  }
 0x70a   : > { %2467 = vmatprep.subr.bf16.mxu0 %v2451_v56  ;;  %v2591_v56 = vsub.f32 0.0, %v5302_v58  ;;  %v4603_v58 = vld [vmem:[%s5714_s11 + $0x98] sm:$0xff]  }
 0x7c4   : > { %v4400_v19 = vpop.f32.mrf.mxu0 }
 0x7c5   : > { %v2266_v4 = vsub.f32 0.0, %v4400_v19 }
 0x7c6   : > { %v2168_v61 = vpop.f32.mrf.mxu0 }
 0x7c8   : > { %v4401_v2 = vpop.f32.mrf.mxu0 }
 0x7c9   : > { %v2267_v5 = vsub.f32 0.0, %v4401_v2  ;;  %v2265_v15 = vpack.c.bf16 %v4401_v2, %v4400_v19  ;;  %v2609_v19 = vpack.c.bf16 %v2592_v57, %v2591_v56  ;;  %v4602_v2 = vld [vmem:[%s5714_s11 + $0x30] sm:$0xff]  }
 0x7ca   : > { %v2171_v6 = vpop.f32.mrf.mxu0 }
 0x7cb   : > { %v2271_v7 = vpack.c.bf16 %v2267_v5, %v2266_v4  ;;  %v2264_v8 = vpack.c.bf16 %v2171_v6, %v2168_v61  ;;  %v2589_v61 = vpack.c.bf16 %v5308_v3, %v5304_v59  ;;  %v4601_v59 = vld [vmem:[%s5714_s11 + $0xa0] sm:$0xff]   ;;  %v4605_v3 = vld [vmem:[%s5714_s11 + $0x90] sm:$0xff]   ;;  %v4607_v5 = vld [vmem:[%s5714_s11 + $0x88] sm:$0xff]  }
 0x7cc   : > { %v4606_v4 = vld [vmem:[%s5714_s11 + $0x20] sm:$0xff]   ;;  %v4608_v6 = vld [vmem:[%s5714_s11 + $0x18] sm:$0xff]  }
 0x7cd   : > { %3933 = vmatmul.mubr.msk.bf16.vlgmr.msra.gmra.mxu0 %vm1913_vm11, %v2271_v7  ;;  %3940 = vmatmul.mubr.msk.bf16.vlgmr.msra.gmra.mxu1 %vm1913_vm11, %v2264_v8  ;;  %v4609_v7 = vld [vmem:[%s5714_s11 + $0x80] sm:$0xff]  }
 0x7ce   : > { %2341 = vmatprep.mubr.bf16.mxu0 %v4696_v51  ;;  %2418 = vmatprep.mubr.bf16.mxu1 %v4696_v51 }
 0x7cf   : > { %2468 = vmatpush1.bf16.msra.mxu0 %v2448_v9  ;;  %2535 = vmatpush1.bf16.msra.mxu1 %v2515_v10  ;;  %v4611_v9 = vld [vmem:[%s5714_s11 + $0x78] sm:$0xff]   ;;  %v4612_v10 = vld [vmem:[%s5714_s11 + $0x8] sm:$0xff]  }
 0x7d0   : > { %2690 = vmatprep.subr.bf16.mxu0 %v4554_v12  ;;  %2823 = vmatprep.subr.bf16.mxu1 %v4557_v13  ;;  %v4614_v12 = vld [vmem:[%s5714_s11] sm:$0xff]   ;;  %v4615_v13 = vld [vmem:[%s5714_s11 + $0x68] sm:$0xff]  }
 0x7d5   : > { %3934 = vmatmul.mubr.msk.bf16.gmra.mxu0 %vm1913_vm11, %v2264_v8  ;;  %3941 = vmatmul.mubr.msk.bf16.gmra.mxu1 %vm1913_vm11, %v2265_v15  ;;  %v4610_v8 = vld [vmem:[%s5714_s11 + $0x10] sm:$0xff]   ;;  %v4617_v15 = vld [vmem:[%s5714_s11 + $0xc8] sm:$0xff]  }
 0x7d6   : > { %2485 = vmatprep.mubr.bf16.mxu0 %v4696_v51  ;;  %2552 = vmatprep.mubr.bf16.mxu1 %v4696_v51 }
 0x7dd   : > { %3944 = vmatmul.mubr.msk.bf16.vlgmr.msra.gmra.mxu0 %vm2199_vm3, %v2435_v23  ;;  %3948 = vmatmul.mubr.msk.bf16.vlgmr.msra.gmra.mxu1 %vm2199_vm3, %v2430_v24  ;;  %v4624_v23 = vld [vmem:[%s5714_s11 + $0x40] sm:$0xff]  }
 0x7de   : > { %2691 = vmatpush1.bf16.msra.mxu0 %v4552_v21  ;;  %2824 = vmatpush1.bf16.msra.mxu1 %v4555_v22  ;;  %v4622_v21 = vld [vmem:[%s5714_s11 + $0x48] sm:$0xff]   ;;  %v4623_v22 = vld [vmem:[%s5714_s11 + $0xb0] sm:$0xff]  }
 0x7df   : > { %2692 = vmatprep.subr.bf16.mxu0 %v4560_v25  ;;  %2825 = vmatprep.subr.bf16.mxu1 %v4563_v26 }
 0x7e0   : > { %2495 = vmatprep.mubr.bf16.mxu0 %v4696_v51  ;;  %2562 = vmatprep.mubr.bf16.mxu1 %v4696_v51 }
 0x7e2   : > { %2693 = vmatpush1.bf16.msra.mxu0 %v4558_v27  ;;  %2826 = vmatpush1.bf16.msra.mxu1 %v4561_v28 }
 0x7e3   : > { %2694 = vmatprep.subr.bf16.mxu0 %v4566_v29  ;;  %2827 = vmatprep.subr.bf16.mxu1 %v4569_v30 }
 0x7e5   : > { %3945 = vmatmul.mubr.msk.bf16.gmra.mxu0 %vm2199_vm3, %v2430_v24  ;;  %3949 = vmatmul.mubr.msk.bf16.gmra.mxu1 %vm2199_vm3, %v2431_v33  ;;  %v4625_v24 = vld [vmem:[%s5714_s11 + $0xa8] sm:$0xff]  }
 0x7e6   : > { %2695 = vmatpush1.bf16.msra.mxu0 %v4564_v31  ;;  %2828 = vmatpush1.bf16.msra.mxu1 %v4567_v32 }
 0x7e7   : > { %2696 = vmatprep.subr.bf16.mxu0 %v4572_v34  ;;  %2829 = vmatprep.subr.bf16.mxu1 %v4575_v35 }
 0x7e8   : > { %2722 = vmatprep.mubr.bf16.mxu0 %v4696_v51  ;;  %2855 = vmatprep.mubr.bf16.mxu1 %v4696_v51 }
 0x7ea   : > { %2697 = vmatpush1.bf16.msra.mxu0 %v4570_v36  ;;  %2830 = vmatpush1.bf16.msra.mxu1 %v4573_v37 }
 0x7eb   : > { %2698 = vmatprep.subr.bf16.mxu0 %v4578_v38  ;;  %2831 = vmatprep.subr.bf16.mxu1 %v4581_v40 }
 0x7ee   : > { %2699 = vmatpush1.bf16.msra.mxu0 %v4576_v41  ;;  %2832 = vmatpush1.bf16.msra.mxu1 %v4579_v42 }
 0x7ef   : > { %2700 = vmatprep.subr.bf16.mxu0 %v4584_v43  ;;  %2833 = vmatprep.subr.bf16.mxu1 %v4587_v44 }
 0x7f2   : > { %2701 = vmatpush1.bf16.msra.mxu0 %v4582_v45  ;;  %2834 = vmatpush1.bf16.msra.mxu1 %v4585_v46 }
 0x7f3   : > { %2702 = vmatprep.subr.bf16.mxu0 %v4590_v47  ;;  %2835 = vmatprep.subr.bf16.mxu1 %v4593_v48 }
 0x7f6   : > { %2703 = vmatpush1.bf16.msra.mxu0 %v4588_v49  ;;  %2836 = vmatpush1.bf16.msra.mxu1 %v4591_v50 }
 0x7f7   : > { %2704 = vmatprep.subr.bf16.mxu0 %v4596_v52  ;;  %2837 = vmatprep.subr.bf16.mxu1 %v4599_v53 }
 0x7fa   : > { %2705 = vmatpush1.bf16.msra.mxu0 %v4594_v54  ;;  %2838 = vmatpush1.bf16.msra.mxu1 %v4597_v55 }
 0x7fb   : > { %3229 = vmatprep.subr.bf16.mxu1 %v4696_v51  ;;  %3099 = vmatprep.subr.bf16.mxu0 %v4696_v51 }
 0x7fd   : > { %2723 = vmatmul.mubr.bf16.vlgmr.msra.gmra.mxu0 %v2609_v19  ;;  %2856 = vmatmul.mubr.bf16.vlgmr.msra.gmra.mxu1 %v2589_v61 }
 0x7fe   : > { %2732 = vmatprep.mubr.bf16.mxu0 %v4696_v51  ;;  %2865 = vmatprep.mubr.bf16.mxu1 %v4696_v51 }
 0x7ff   : > { %3230 = vmatpush1.bf16.msra.mxu1 %v4600_v0  ;;  %3100 = vmatpush1.bf16.msra.mxu0 %v4601_v59 }
 0x800   : > { %3231 = vmatprep.subr.bf16.mxu1 %v4696_v51  ;;  %3101 = vmatprep.subr.bf16.mxu0 %v4696_v51 }
 0x803   : > { %3232 = vmatpush1.bf16.msra.mxu1 %v4602_v2  ;;  %3102 = vmatpush1.bf16.msra.mxu0 %v4603_v58 }
 0x804   : > { %3233 = vmatprep.subr.bf16.mxu1 %v4696_v51  ;;  %3103 = vmatprep.subr.bf16.mxu0 %v4696_v51 }
 0x805   : > { %2733 = vmatmul.mubr.bf16.gmra.mxu0 %v2589_v61  ;;  %2866 = vmatmul.mubr.bf16.gmra.mxu1 %v2590_v63 }
 0x807   : > { %3234 = vmatpush1.bf16.msra.mxu1 %v4604_v60  ;;  %3104 = vmatpush1.bf16.msra.mxu0 %v4605_v3 }
 0x808   : > { %3235 = vmatprep.subr.bf16.mxu1 %v4696_v51  ;;  %3105 = vmatprep.subr.bf16.mxu0 %v4696_v51 }
 0x80b   : > { %3236 = vmatpush1.bf16.msra.mxu1 %v4606_v4  ;;  %3106 = vmatpush1.bf16.msra.mxu0 %v4607_v5 }
 0x80c   : > { %3237 = vmatprep.subr.bf16.mxu1 %v4696_v51  ;;  %3107 = vmatprep.subr.bf16.mxu0 %v4696_v51 }
 0x80f   : > { %3238 = vmatpush1.bf16.msra.mxu1 %v4608_v6  ;;  %3108 = vmatpush1.bf16.msra.mxu0 %v4609_v7 }
 0x810   : > { %3239 = vmatprep.subr.bf16.mxu1 %v4696_v51  ;;  %3109 = vmatprep.subr.bf16.mxu0 %v4696_v51 }
 0x813   : > { %3240 = vmatpush1.bf16.msra.mxu1 %v4610_v8  ;;  %3110 = vmatpush1.bf16.msra.mxu0 %v4611_v9 }
 0x814   : > { %3241 = vmatprep.subr.bf16.mxu1 %v4696_v51  ;;  %3111 = vmatprep.subr.bf16.mxu0 %v4696_v51 }
 0x817   : > { %3242 = vmatpush1.bf16.msra.mxu1 %v4612_v10  ;;  %3112 = vmatpush1.bf16.msra.mxu0 %v4613_v11 }
 0x818   : > { %3243 = vmatprep.subr.bf16.mxu1 %v4696_v51  ;;  %3113 = vmatprep.subr.bf16.mxu0 %v4696_v51 }
 0x81b   : > { %3244 = vmatpush1.bf16.msra.mxu1 %v4614_v12  ;;  %3114 = vmatpush1.bf16.msra.mxu0 %v4615_v13 }
 0x81c   : > { %3251 = vmatprep.subr.bf16.mxu1 %v4696_v51  ;;  %3121 = vmatprep.subr.bf16.mxu0 %v4696_v51 }
 0x81f   : > { %3252 = vmatpush2.bf16.msra.mxu1 %v4616_v14  ;;  %3122 = vmatpush2.bf16.msra.mxu0 %v4617_v15 }
 0x820   : > { %3253 = vmatprep.subr.bf16.mxu1 %v4696_v51  ;;  %3123 = vmatprep.subr.bf16.mxu0 %v4696_v51 }
 0x823   : > { %3254 = vmatpush2.bf16.msra.mxu1 %v4618_v16  ;;  %3124 = vmatpush2.bf16.msra.mxu0 %v4619_v17 }
 0x824   : > { %3255 = vmatprep.subr.bf16.mxu1 %v4696_v51  ;;  %3125 = vmatprep.subr.bf16.mxu0 %v4696_v51 }
 0x827   : > { %3256 = vmatpush2.bf16.msra.mxu1 %v4620_v18  ;;  %3126 = vmatpush2.bf16.msra.mxu0 %v4621_v20 }
 0x828   : > { %3257 = vmatprep.subr.bf16.mxu1 %v4696_v51  ;;  %3127 = vmatprep.subr.bf16.mxu0 %v4696_v51 }
 0x82b   : > { %3258 = vmatpush2.bf16.msra.mxu1 %v4622_v21  ;;  %3128 = vmatpush2.bf16.msra.mxu0 %v4623_v22 }
 0x82c   : > { %3259 = vmatprep.subr.bf16.mxu1 %v4696_v51  ;;  %3129 = vmatprep.subr.bf16.mxu0 %v4696_v51 }
 0x82f   : > { %3260 = vmatpush2.bf16.msra.mxu1 %v4624_v23  ;;  %3130 = vmatpush2.bf16.msra.mxu0 %v4625_v24 }
 0x830   : > { %4408 = vmatprep.subr.bf16.mxu0 %v4693_v39 }
 0x88d   : > { %v2333_v25 = vpop.f32.mrf.mxu0  ;;  %v2410_v26 = vpop.f32.mrf.mxu1 }
 0x88e   : > { %v2411_v16 = vadd.f32 %v2410_v26, %v2333_v25 }
 0x88f   : > { %v2335_v27 = vpop.f32.mrf.mxu0  ;;  %v2412_v28 = vpop.f32.mrf.mxu1 }
 0x890   : > { %v2413_v8 = vadd.f32 %v2412_v28, %v2335_v27 }
 0x891   : > { %v2337_v29 = vpop.f32.mrf.mxu0  ;;  %v2414_v30 = vpop.f32.mrf.mxu1 }
 0x892   : > { %v2415_v58 = vadd.f32 %v2414_v30, %v2337_v29  ;;  %v2885_v27 = vmul.f32 %v2413_v8, %v2413_v8  ;;  %v2906_v30 = vadd.s32 8, %v4948_v62 }
 0x893   : > { %v2339_v31 = vpop.f32.mrf.mxu0  ;;  %v2416_v32 = vpop.f32.mrf.mxu1 }
 0x894   : > { %v2417_v9 = vadd.f32 %v2416_v32, %v2339_v31  ;;  %v2886_v17 = vmul.f32 %v2415_v58, %v2415_v58  ;;  %vm2908_vm4 = vcmp.ge.s32.totalorder %v2906_v30, 14 }
 0x895   : > { %v2343_v33 = vpop.f32.mrf.mxu0  ;;  %v2420_v34 = vpop.f32.mrf.mxu1 }
 0x896   : > { %v2421_v10 = vadd.f32 %v2420_v34, %v2343_v33  ;;  %v2887_v28 = vmul.f32 %v2417_v9, %v2417_v9  ;;  %v2884_v33 = vmul.f32 %v2411_v16, %v2411_v16 }
 0x897   : > { %v2345_v35 = vpop.f32.mrf.mxu0  ;;  %v2422_v36 = vpop.f32.mrf.mxu1 }
 0x898   : > { %v2423_v60 = vadd.f32 %v2422_v36, %v2345_v35  ;;  %v2888_v29 = vmul.f32 %v2421_v10, %v2421_v10 }
 0x899   : > { %v2347_v37 = vpop.f32.mrf.mxu0  ;;  %v2424_v38 = vpop.f32.mrf.mxu1 }
 0x89a   : > { %v2425_v63 = vadd.f32 %v2424_v38, %v2347_v37  ;;  %v2889_v18 = vmul.f32 %v2423_v60, %v2423_v60 }
 0x89b   : > { %v2349_v40 = vpop.f32.mrf.mxu0  ;;  %v2426_v41 = vpop.f32.mrf.mxu1 }
 0x89c   : > { %v2427_v3 = vadd.f32 %v2426_v41, %v2349_v40  ;;  %v2890_v11 = vmul.f32 %v2425_v63, %v2425_v63 }
 0x89d   : > { %v2487_v42 = vpop.f32.mrf.mxu0  ;;  %v2554_v43 = vpop.f32.mrf.mxu1 }
 0x89e   : > { %v2555_v12 = vadd.f32 %v2554_v43, %v2487_v42  ;;  %v2891_v20 = vmul.f32 %v2427_v3, %v2427_v3 }
 0x89f   : > { %v2489_v44 = vpop.f32.mrf.mxu0  ;;  %v2556_v45 = vpop.f32.mrf.mxu1 }
 0x8a0   : > { %v5545_v4 = vadd.f32 %v2556_v45, %v2489_v44  ;;  %v2876_v31 = vmul.f32 %v2555_v12, %v2555_v12 }
 0x8a1   : > { %v2491_v46 = vpop.f32.mrf.mxu0  ;;  %v2558_v47 = vpop.f32.mrf.mxu1 }
 0x8a2   : > { %v5539_v0 = vadd.f32 %v2558_v47, %v2491_v46  ;;  %v2877_v21 = vmul.f32 %v5545_v4, %v5545_v4  ;;  %v2892_v41 = vadd.f32 %v2884_v33, %v2876_v31 }
 0x8a3   : > { %v2493_v48 = vpop.f32.mrf.mxu0  ;;  %v2560_v49 = vpop.f32.mrf.mxu1 }
 0x8a4   : > { %v5547_v5 = vadd.f32 %v2560_v49, %v2493_v48  ;;  %v2878_v13 = vmul.f32 %v5539_v0, %v5539_v0  ;;  %v2893_v34 = vadd.f32 %v2885_v27, %v2877_v21 }
 0x8a5   : > { %v2497_v50 = vpop.f32.mrf.mxu0  ;;  %v2564_v52 = vpop.f32.mrf.mxu1 }
 0x8a6   : > { %v5549_v6 = vadd.f32 %v2564_v52, %v2497_v50  ;;  %v2879_v22 = vmul.f32 %v5547_v5, %v5547_v5  ;;  %v2894_v25 = vadd.f32 %v2886_v17, %v2878_v13 }
 0x8a7   : > { %v2499_v53 = vpop.f32.mrf.mxu0  ;;  %v2566_v54 = vpop.f32.mrf.mxu1 }
 0x8a8   : > { %v5541_v59 = vadd.f32 %v2566_v54, %v2499_v53  ;;  %v2880_v23 = vmul.f32 %v5549_v6, %v5549_v6  ;;  %v2895_v35 = vadd.f32 %v2887_v28, %v2879_v22 }
 0x8a9   : > { %v2501_v55 = vpop.f32.mrf.mxu0  ;;  %v2568_v56 = vpop.f32.mrf.mxu1 }
 0x8aa   : > { %v5537_v61 = vadd.f32 %v2568_v56, %v2501_v55  ;;  %v2881_v14 = vmul.f32 %v5541_v59, %v5541_v59  ;;  %v2896_v36 = vadd.f32 %v2888_v29, %v2880_v23 }
 0x8ab   : > { %v2503_v57 = vpop.f32.mrf.mxu0  ;;  %v2570_v19 = vpop.f32.mrf.mxu1 }
 0x8ac   : > { %v5543_v2 = vadd.f32 %v2570_v19, %v2503_v57  ;;  %v2882_v7 = vmul.f32 %v5537_v61, %v5537_v61  ;;  %v2897_v26 = vadd.f32 %v2889_v18, %v2881_v14  ;;  %v2900_v46 = vadd.f32 %v2896_v36, %v2892_v41 }
 0x8ae   : > { %v2883_v15 = vmul.f32 %v5543_v2, %v5543_v2  ;;  %v2898_v24 = vadd.f32 %v2890_v11, %v2882_v7  ;;  %v2901_v42 = vadd.f32 %v2897_v26, %v2893_v34 }
 0x8b0   : > { %v2899_v32 = vadd.f32 %v2891_v20, %v2883_v15  ;;  %v2902_v37 = vadd.f32 %v2898_v24, %v2894_v25  ;;  %4677 = vrcp.f32 %v2901_v42 }
 0x8b2   : > { %v2903_v43 = vadd.f32 %v2899_v32, %v2895_v35  ;;  %v2915_v47 = vsel %vm2908_vm4, 1.0, %v2902_v37 }
 0x8b3   : > { %4679 = vrcp.f32 %v2915_v47 }
 0x8b4   : > { %v2916_v50 = vsel %vm2908_vm4, 1.0, %v2903_v43  ;;  %4681 = vrcp.f32 %v2900_v46 }
 0x8b5   : > { %4683 = vrcp.f32 %v2916_v50 }
 0x8bd   : > { %v2724_v38 = vpop.f32.mrf.mxu0  ;;  %v2857_v40 = vpop.f32.mrf.mxu1 }
 0x8be   : > { %v2858_v57 = vadd.f32 %v2857_v40, %v2724_v38  ;;  %v4678_v26 = vpop.eup %4677 }
 0x8bf   : > { %v2726_v44 = vpop.f32.mrf.mxu0  ;;  %v2859_v45 = vpop.f32.mrf.mxu1 }
 0x8c0   : > { %v2860_v19 = vadd.f32 %v2859_v45, %v2726_v44  ;;  %v2921_v14 = vmul.f32 %v2858_v57, %v2555_v12  ;;  %v2941_v15 = vmul.f32 %v2858_v57, %v5549_v6  ;;  %v4629_v57 = vld [vmem:[%s5710_s7 + $0xe4] ss:$16 sps:$4 sm:$0xff]  }
 0x8c1   : > { %v2728_v48 = vpop.f32.mrf.mxu0  ;;  %v2861_v49 = vpop.f32.mrf.mxu1  ;;  %3547 = vmatprep.subr.bf16.mxu1 %v4629_v57  ;;  %v3381_v57 = vsub.s32 3, %v4948_v62 }
 0x8c2   : > { %v2862_v60 = vadd.f32 %v2861_v49, %v2728_v48  ;;  %v2942_v16 = vmul.f32 %v2860_v19, %v5541_v59  ;;  %v2922_v21 = vmul.f32 %v2860_v19, %v5545_v4  ;;  %v4635_v19 = vld [vmem:[%s5710_s7 + $0xc4] ss:$16 sps:$4 sm:$0xff]  }
 0x8c3   : > { %v2730_v52 = vpop.f32.mrf.mxu0  ;;  %v2863_v53 = vpop.f32.mrf.mxu1 }
 0x8c4   : > { %v2864_v9 = vadd.f32 %v2863_v53, %v2730_v52  ;;  %v2923_v22 = vmul.f32 %v2862_v60, %v5539_v0  ;;  %v2943_v23 = vmul.f32 %v2862_v60, %v5537_v61  ;;  %v4639_v60 = vld [vmem:[%s5710_s7 + $0xa0] ss:$16 sps:$4 sm:$0xff]  }
 0x8c5   : > { %v2734_v54 = vpop.f32.mrf.mxu0  ;;  %v2867_v55 = vpop.f32.mrf.mxu1 }
 0x8c6   : > { %v2868_v56 = vadd.f32 %v2867_v55, %v2734_v54  ;;  %v2924_v30 = vmul.f32 %v2864_v9, %v5547_v5 }
 0x8c7   : > { %v2736_v63 = vpop.f32.mrf.mxu0  ;;  %v2869_v58 = vpop.f32.mrf.mxu1 }
 0x8c8   : > { %v2870_v3 = vadd.f32 %v2869_v58, %v2736_v63  ;;  %v2937_v10 = vmul.f32 %v2868_v56, %v2555_v12  ;;  %v2925_v24 = vmul.f32 %v2868_v56, %v5549_v6  ;;  %v4680_v6 = vpop.eup %4679  ;;  %v4627_v56 = vld [vmem:[%s5710_s7 + $0xe0] ss:$16 sps:$4 sm:$0xff]   ;;  %v4641_v58 = vld [vmem:[%s5710_s7 + $0xa4] ss:$16 sps:$4 sm:$0xff]  }
 0x8c9   : > { %v2738_v7 = vpop.f32.mrf.mxu0  ;;  %v2871_v8 = vpop.f32.mrf.mxu1  ;;  %v4633_v63 = vld [vmem:[%s5710_s7 + $0xc0] ss:$16 sps:$4 sm:$0xff]  }
 0x8ca   : > { %v2926_v11 = vmul.f32 %v2870_v3, %v5541_v59  ;;  %v2938_v13 = vmul.f32 %v2870_v3, %v5545_v4  ;;  %v2872_v17 = vadd.f32 %v2871_v8, %v2738_v7  ;;  %v2944_v59 = vmul.f32 %v2864_v9, %v5543_v2  ;;  %v4682_v36 = vpop.eup %4681  ;;  %v4647_v3 = vld [vmem:[%s5710_s7 + $0x84] ss:$16 sps:$4 sm:$0xff]   ;;  %v4645_v7 = vld [vmem:[%s5710_s7 + $0x80] ss:$16 sps:$4 sm:$0xff]  }
 0x8cb   : > { %v2740_v18 = vpop.f32.mrf.mxu0  ;;  %v2873_v20 = vpop.f32.mrf.mxu1  ;;  %v2945_v31 = vsub.f32 %v2937_v10, %v2941_v15  ;;  %v2929_v35 = vadd.f32 %v2925_v24, %v2921_v14  ;;  %v4653_v8 = vld [vmem:[%s5710_s7 + $0x64] ss:$16 sps:$4 sm:$0xff]   ;;  %v4651_v9 = vld [vmem:[%s5710_s7 + $0x60] ss:$16 sps:$4 sm:$0xff]  }
 0x8cc   : > { %v2946_v27 = vsub.f32 %v2938_v13, %v2942_v16  ;;  %v2927_v28 = vmul.f32 %v2872_v17, %v5537_v61  ;;  %v2939_v12 = vmul.f32 %v2872_v17, %v5539_v0  ;;  %v2874_v29 = vadd.f32 %v2873_v20, %v2740_v18  ;;  %v4684_v40 = vpop.eup %4683  ;;  %v4659_v10 = vld [vmem:[%s5710_s7 + $0x44] ss:$16 sps:$4 sm:$0xff]   ;;  %v4663_v14 = vld [vmem:[%s5710_s7 + $0x20] ss:$16 sps:$4 sm:$0xff]  }
 0x8cd   : > { %v2930_v25 = vadd.f32 %v2926_v11, %v2922_v21  ;;  %v2949_v41 = vmul.f32 %v4682_v36, %v2945_v31  ;;  %v2933_v46 = vmul.f32 %v4682_v36, %v2929_v35  ;;  %v4657_v11 = vld [vmem:[%s5710_s7 + $0x40] ss:$16 sps:$4 sm:$0xff]   ;;  %v4665_v13 = vld [vmem:[%s5710_s7 + $0x24] ss:$16 sps:$4 sm:$0xff]   ;;  %v4626_v35 = vld [vmem:[%s5705_s2 + $0x88] sm:$0xff]  }
 0x8ce   : > { %v2931_v4 = vadd.f32 %v2927_v28, %v2923_v22  ;;  %v2947_v32 = vsub.f32 %v2939_v12, %v2943_v23  ;;  %v2928_v33 = vmul.f32 %v2874_v29, %v5543_v2  ;;  %v2940_v34 = vmul.f32 %v2874_v29, %v5547_v5  ;;  %v4630_v36 = vld [vmem:[%s5710_s7 + $0xe8] ss:$16 sps:$4 sm:$0xff]  }
 0x8cf   : > { %v2950_v61 = vmul.f32 %v4678_v26, %v2946_v27  ;;  %v2934_v43 = vmul.f32 %v4678_v26, %v2930_v25  ;;  %v2983_v50 = vsub.f32 0.0, %v2949_v41 }
 0x8d0   : > { %v2951_v37 = vmul.f32 %v4680_v6, %v2947_v32  ;;  %v2932_v0 = vadd.f32 %v2928_v33, %v2924_v30  ;;  %v2948_v38 = vsub.f32 %v2940_v34, %v2944_v59  ;;  %v2935_v42 = vmul.f32 %v4680_v6, %v2931_v4  ;;  %v4632_v34 = vld [vmem:[%s5710_s7 + $0xec] ss:$16 sps:$4 sm:$0xff]  }
 0x8d1   : > { %v2984_v48 = vsub.f32 0.0, %v2950_v61 }
 0x8d2   : > { %v2936_v44 = vmul.f32 %v4684_v40, %v2932_v0  ;;  %v2952_v45 = vmul.f32 %v4684_v40, %v2948_v38  ;;  %v2985_v47 = vsub.f32 0.0, %v2951_v37  ;;  %v2979_v5 = vpack.c.bf16 %v2935_v42, %v2933_v46  ;;  %v4642_v0 = vld [vmem:[%s5710_s7 + $0xa8] ss:$16 sps:$4 sm:$0xff]   ;;  %v4650_v38 = vld [vmem:[%s5710_s7 + $0x8c] ss:$16 sps:$4 sm:$0xff]  }
 0x8d3   : > { %v2981_v55 = vpack.c.bf16 %v2951_v37, %v2949_v41  ;;  %v4644_v37 = vld [vmem:[%s5710_s7 + $0xac] ss:$16 sps:$4 sm:$0xff]   ;;  %v4654_v41 = vld [vmem:[%s5710_s7 + $0x68] ss:$16 sps:$4 sm:$0xff]   ;;  %v4669_v46 = vld [vmem:[%s5710_s7] ss:$16 sps:$4 sm:$0xff]  }
 0x8d4   : > { %v2986_v49 = vsub.f32 0.0, %v2952_v45  ;;  %v2980_v2 = vpack.c.bf16 %v2936_v44, %v2934_v43  ;;  %v2982_v53 = vpack.c.bf16 %v2952_v45, %v2950_v61  ;;  %v3013_v54 = vpack.c.bf16 %v2985_v47, %v2983_v50  ;;  %v4636_v61 = vld [vmem:[%s5710_s7 + $0xc8] ss:$16 sps:$4 sm:$0xff]   ;;  %v4656_v40 = vld [vmem:[%s5710_s7 + $0x6c] ss:$16 sps:$4 sm:$0xff]  }
 0x8d5   : > { %v4662_v42 = vld [vmem:[%s5710_s7 + $0x4c] ss:$16 sps:$4 sm:$0xff]   ;;  %v4660_v43 = vld [vmem:[%s5710_s7 + $0x48] ss:$16 sps:$4 sm:$0xff]   ;;  %v4671_v47 = vld [vmem:[%s5710_s7 + $0x4] ss:$16 sps:$4 sm:$0xff]  }
 0x8d6   : > { %4010 = vmatprep.mubr.msk.bf16.mxu1 %vm1853_vm10, %v2980_v2  ;;  %v3014_v52 = vpack.c.bf16 %v2986_v49, %v2984_v48  ;;  %v4668_v44 = vld [vmem:[%s5710_s7 + $0x2c] ss:$16 sps:$4 sm:$0xff]   ;;  %v4666_v45 = vld [vmem:[%s5710_s7 + $0x28] ss:$16 sps:$4 sm:$0xff]  }
 0x8d7   : > { %3262 = vmatmul.mubr.bf16.vlgmr.msra.gmra.mxu1 %v2979_v5  ;;  %v4672_v48 = vld [vmem:[%s5710_s7 + $0x8] ss:$16 sps:$4 sm:$0xff]   ;;  %v4674_v49 = vld [vmem:[%s5710_s7 + $0xc] ss:$16 sps:$4 sm:$0xff]  }
 0x8d8   : > { %3995 = vmatprep.mubr.msk.bf16.mxu0 %vm1853_vm10, %v3014_v52  ;;  %4011 = vmatprep.mubr.msk.bf16.mxu1 %vm1853_vm10, %v2982_v53 }
 0x8d9   : > { %3132 = vmatmul.mubr.bf16.vlgmr.msra.gmra.mxu0 %v3013_v54  ;;  %3548 = vmatpush1.bf16.msra.mxu1 %v4627_v56  ;;  %v3377_v54 = vsub.s32 2, %v4948_v62  ;;  %v3373_v56 = vsub.s32 1, %v4948_v62 }
 0x8da   : > { %3996 = vmatprep.mubr.msk.bf16.mxu0 %vm1853_vm10, %v2980_v2  ;;  %3549 = vmatprep.subr.bf16.mxu1 %v4635_v19 }
 0x8dd   : > { %3550 = vmatpush1.bf16.msra.mxu1 %v4633_v63 }
 0x8de   : > { %3551 = vmatprep.subr.bf16.mxu1 %v4641_v58 }
 0x8df   : > { %3270 = vmatmul.mubr.bf16.gmra.mxu1 %v2981_v55  ;;  %v3365_v55 = vld [vmem:[%s5711_s8] sm:$0xf] }
 0x8e0   : > { %3579 = vmatprep.mubr.bf16.mxu1 %v4696_v51  ;;  %v3370_v19 = vrot.slane %v3365_v55, %v4954_v1  ;;  %v3378_v63 = vrot.slane %v3365_v55, %v3377_v54  ;;  %v3374_v58 = vrot.slane %v3365_v55, %v3373_v56 }
 0x8e1   : > { %3140 = vmatmul.mubr.bf16.gmra.mxu0 %v2979_v5  ;;  %3552 = vmatpush1.bf16.msra.mxu1 %v4639_v60  ;;  %v3382_v60 = vrot.slane %v3365_v55, %v3381_v57 }
 0x8e2   : > { %4412 = vmatprep.mubr.msk.bf16.mxu0 %vm4694_vm0, %v4693_v39  ;;  %3553 = vmatprep.subr.bf16.mxu1 %v4647_v3  ;;  %vm3287_vm0 = vcmask 261120  }
 0x8e5   : > { %3554 = vmatpush1.bf16.msra.mxu1 %v4645_v7 }
 0x8e6   : > { %3555 = vmatprep.subr.bf16.mxu1 %v4653_v8 }
 0x8e9   : > { %3556 = vmatpush1.bf16.msra.mxu1 %v4651_v9 }
 0x8ea   : > { %3557 = vmatprep.subr.bf16.mxu1 %v4659_v10 }
 0x8ed   : > { %3558 = vmatpush1.bf16.msra.mxu1 %v4657_v11 }
 0x8ee   : > { %3559 = vmatprep.subr.bf16.mxu1 %v4665_v13 }
 0x8f1   : > { %3560 = vmatpush1.bf16.msra.mxu1 %v4663_v14 }
 0x8f2   : > { %3561 = vmatprep.subr.bf16.mxu1 %v4671_v47 }
 0x8f5   : > { %3562 = vmatpush1.bf16.msra.mxu1 %v4669_v46 }
 0x997   : > { %v3263_v15 = vpop.f32.mrf.mxu1 }
 0x999   : > { %v3133_v16 = vpop.f32.mrf.mxu0  ;;  %v3265_v17 = vpop.f32.mrf.mxu1 }
 0x99a   : > { %v3264_v33 = vadd.f32 %v3263_v15, %v3133_v16 }
 0x99b   : > { %v3135_v18 = vpop.f32.mrf.mxu0  ;;  %v3266_v20 = vpop.f32.mrf.mxu1 }
 0x99d   : > { %v3136_v21 = vpop.f32.mrf.mxu0  ;;  %v3268_v22 = vpop.f32.mrf.mxu1 }
 0x99e   : > { %v3267_v4 = vadd.f32 %v3266_v20, %v3136_v21 }
 0x99f   : > { %v3138_v23 = vpop.f32.mrf.mxu0  ;;  %v3271_v24 = vpop.f32.mrf.mxu1 }
 0x9a0   : > { %v3280_v6 = vpack.c.bf16 %v3267_v4, %v3264_v33 }
 0x9a1   : > { %v3141_v27 = vpop.f32.mrf.mxu0  ;;  %v3273_v28 = vpop.f32.mrf.mxu1 }
 0x9a2   : > { %v3272_v31 = vadd.f32 %v3271_v24, %v3141_v27 }
 0x9a3   : > { %v3143_v12 = vpop.f32.mrf.mxu0  ;;  %v3274_v29 = vpop.f32.mrf.mxu1 }
 0x9a5   : > { %v3144_v30 = vpop.f32.mrf.mxu0  ;;  %v3276_v59 = vpop.f32.mrf.mxu1 }
 0x9a6   : > { %v3275_v25 = vadd.f32 %v3274_v29, %v3144_v30 }
 0x9a7   : > { %v3146_v26 = vpop.f32.mrf.mxu0 }
 0x9a8   : > { %v3281_v32 = vpack.c.bf16 %v3275_v25, %v3272_v31 }
 0x9aa   : > { %4409 = vmatpush3.bf16.msra.mxu0 %v3281_v32 }
 0x9ab   : > { %4410 = vmatprep.subr.bf16.mxu0 %v4693_v39  ;;  %v4638_v39 = vld [vmem:[%s5710_s7 + $0xcc] ss:$16 sps:$4 sm:$0xff]  }
 0x9ae   : > { %4411 = vmatpush3.bf16.msra.mxu0 %v3280_v6 }
 0x9af   : > { %3590 = vmatprep.subr.bf16.mxu0 %v4632_v34 }
 0x9b1   : > { %4413 = vmatmul.mubr.msk.bf16.vlgmr.msra.gmra.mxu0 %vm3287_vm0, %v4626_v35 }
 0x9b2   : > { %3591 = vmatpush1.bf16.msra.mxu0 %v4630_v36  ;;  %3622 = vmatprep.mubr.bf16.mxu0 %v4696_v51  ;;  %v4648_v51 = vld [vmem:[%s5710_s7 + $0x88] ss:$16 sps:$4 sm:$0xff]  }
 0x9b3   : > { %3592 = vmatprep.subr.bf16.mxu0 %v4638_v39 }
 0x9b6   : > { %3593 = vmatpush1.bf16.msra.mxu0 %v4636_v61 }
 0x9b7   : > { %3594 = vmatprep.subr.bf16.mxu0 %v4644_v37 }
 0x9ba   : > { %3595 = vmatpush1.bf16.msra.mxu0 %v4642_v0 }
 0x9bb   : > { %3596 = vmatprep.subr.bf16.mxu0 %v4650_v38 }
 0x9be   : > { %3597 = vmatpush1.bf16.msra.mxu0 %v4648_v51 }
 0x9bf   : > { %3598 = vmatprep.subr.bf16.mxu0 %v4656_v40 }
 0x9c2   : > { %3599 = vmatpush1.bf16.msra.mxu0 %v4654_v41 }
 0x9c3   : > { %3600 = vmatprep.subr.bf16.mxu0 %v4662_v42 }
 0x9c6   : > { %3601 = vmatpush1.bf16.msra.mxu0 %v4660_v43 }
 0x9c7   : > { %3602 = vmatprep.subr.bf16.mxu0 %v4668_v44 }
 0x9ca   : > { %3603 = vmatpush1.bf16.msra.mxu0 %v4666_v45 }
 0x9cb   : > { %3604 = vmatprep.subr.bf16.mxu0 %v4674_v49 }
 0x9ce   : > { %3605 = vmatpush1.bf16.msra.mxu0 %v4672_v48 }
 0xa71   : > { %v3325_v2 = vpop.f32.mrf.mxu0 }
 0xa73   : > { %v4414_v50 = vpop.f32.mrf.mxu0 }
 0xa75   : > { %v3328_v5 = vpop.f32.mrf.mxu0 }
 0xa76   : > { %v3364_v52 = vpack.c.bf16 %v3328_v5, %v3325_v2 }
 0xa77   : > { %v4415_v53 = vpop.f32.mrf.mxu0 }
 0xa78   : > { %3580 = vmatmul.mubr.bf16.vlgmr.msra.gmra.mxu1 %v3364_v52  ;;  %3623 = vmatmul.mubr.bf16.vlgmr.msra.gmra.mxu0 %v3364_v52 }
 0xb38   : > { %v3581_v3 = vpop.f32.mrf.mxu1  ;;  %v3624_v7 = vpop.f32.mrf.mxu0 }
 0xb39   : > { %v3582_v8 = vadd.f32 %v3581_v3, %v3370_v19  ;;  %v3625_v9 = vadd.f32 %v3624_v7, %v3378_v63 }
 0xb3a   : > { %v3583_v10 = vpop.f32.mrf.mxu1  ;;  %v3626_v11 = vpop.f32.mrf.mxu0 }
 0xb3b   : > { %3633 = vst [vmem:[%s430_s26] sm:$0xff] %v3582_v8  ;;  %3635 = vst [vmem:[%s430_s26 + $0x10] sm:$0xff] %v3625_v9  ;;  %v3584_v13 = vadd.f32 %v3583_v10, %v3374_v58  ;;  %v3627_v62 = vadd.f32 %v3626_v11, %v3382_v60 }
 0xb3c   : > { %v3585_v14 = vpop.f32.mrf.mxu1  ;;  %v3628_v1 = vpop.f32.mrf.mxu0 }
 0xb3d   : > { %3634 = vst [vmem:[%s430_s26 + $0x8] sm:$0xff] %v3584_v13  ;;  %3636 = vst [vmem:[%s430_s26 + $0x18] sm:$0xff] %v3627_v62  ;;  %v3586_v15 = vadd.f32 %v3585_v14, %v3370_v19  ;;  %v3629_v16 = vadd.f32 %v3628_v1, %v3378_v63 }
 0xb3e   : > { %v3587_v17 = vpop.f32.mrf.mxu1  ;;  %v3630_v18 = vpop.f32.mrf.mxu0 }
 0xb3f   : > { %3637 = vst [vmem:[%s430_s26 + $0x20] sm:$0xff] %v3586_v15  ;;  %3639 = vst [vmem:[%s430_s26 + $0x30] sm:$0xff] %v3629_v16  ;;  %v3588_v20 = vadd.f32 %v3587_v17, %v3374_v58  ;;  %v3631_v21 = vadd.f32 %v3630_v18, %v3382_v60 }
 0xb41   : > { %3638 = vst [vmem:[%s430_s26 + $0x28] sm:$0xff] %v3588_v20  ;;  %3640 = vst [vmem:[%s430_s26 + $0x38] sm:$0xff] %v3631_v21 }
 0xb42 PF: > { %s22_s21 = sadd.s32 1, %s4691_s21  }
 0xb43   : > { %p19_p4 = scmp.ge.s32.totalorder %s22_s21, 4  }
 0xb45   :  { %21 = sbr.rel (!%p19_p4) target bundleno = 1 (0x1), region = 107 }

</bundles_post_ra>
